<compile_context>
chip_gen: v7x
topology: tpu7x:2x2x1
jax: 0.10.0
libtpu: 0.0.40
codegen_flags: <defaults>
</compile_context>

<pallas_src>
import functools

import jax
import jax.numpy as jnp
from jax.experimental import pallas as pl
from jax.experimental.pallas import tpu as pltpu


def _layernorm(y, gamma, beta, eps=1e-5):
    mean = jnp.mean(y, axis=-1, keepdims=True)
    var = jnp.mean(jnp.square(y - mean), axis=-1, keepdims=True)
    return (y - mean) * jax.lax.rsqrt(var + eps) * gamma + beta


def encoder_stack_kernel(
    # inputs (refs)
    x_ref,                      # (Bt, S, D)  layer-0 input sequences
    wqkv_ref, bqkv_ref,         # (1, D, 3D) bf16 / (1, 1, 3D) f32  (q part pre-scaled)
    wo_ref, bo_ref,             # (1, D, D)  bf16 / (1, 1, D)  f32
    g1_ref, be1_ref,            # (1, 1, D)  layernorm1
    w1_ref, b1_ref,             # (1, D, F)  bf16 / (1, 1, F)
    gf_ref, bf_ref,             # (1, 1, F)  layernorm inside ffn
    w2_ref, b2_ref,             # (1, F, D)  bf16 / (1, 1, D)
    g2_ref, be2_ref,            # (1, 1, D)  layernorm2
    # output (doubles as the resident running activation across layers)
    o_ref,                      # (Bt, S, D)
    *, num_heads: int,
):
    layer = pl.program_id(1)

    # Layer 0: seed the resident output block with the input sequences.
    @pl.when(layer == 0)
    def _():
        o_ref[...] = x_ref[...]

    Bt, S, D = o_ref.shape
    H = num_heads
    hd = D // H
    M = Bt * S

    x = o_ref[...].astype(jnp.float32).reshape(M, D)   # running activation, f32
    x_b = x.astype(jnp.bfloat16)

    # ---- fused QKV projection: one (M, D) @ (D, 3D) matmul, f32 accumulation ----
    qkv = jnp.dot(x_b, wqkv_ref[0], preferred_element_type=jnp.float32) + bqkv_ref[0]
    qkv = qkv.astype(jnp.bfloat16).reshape(Bt, S, 3 * D)
    q = qkv[..., :D]                 # 1/sqrt(hd) already folded into wq / bq
    k = qkv[..., D:2 * D]
    v = qkv[..., 2 * D:]

    # ---- attention core: rank-3 batched-over-Bt einsums, short Python loop over heads ----
    ctx_heads = []
    for h in range(H):
        sl = slice(h * hd, (h + 1) * hd)
        s = jnp.einsum("bqd,bkd->bqk", q[..., sl], k[..., sl],
                       preferred_element_type=jnp.float32)          # (Bt, S, S)
        s = s - jnp.max(s, axis=-1, keepdims=True)
        e = jnp.exp(s)
        p = e * pl.reciprocal(jnp.sum(e, axis=-1, keepdims=True), approx=True)
        ctx_heads.append(
            jnp.einsum("bqk,bkd->bqd", p.astype(jnp.bfloat16), v[..., sl],
                       preferred_element_type=jnp.float32))          # (Bt, S, hd)

    # Head concat + single output-projection matmul with full contraction depth K = D.
    ctx = jnp.concatenate(ctx_heads, axis=-1).astype(jnp.bfloat16).reshape(M, D)
    attn = jnp.dot(ctx, wo_ref[0], preferred_element_type=jnp.float32) + bo_ref[0]

    # ---- residual + layernorm 1 ----  (dropout = identity in eval mode)
    x1 = _layernorm(x + attn, g1_ref[0], be1_ref[0])

    # ---- FFN: Linear -> ReLU -> (Dropout) -> LayerNorm -> Linear -> ReLU ----
    h1 = jnp.dot(x1.astype(jnp.bfloat16), w1_ref[0],
                 preferred_element_type=jnp.float32) + b1_ref[0]
    h1 = jnp.maximum(h1, 0.0)
    h1 = _layernorm(h1, gf_ref[0], bf_ref[0])
    h2 = jnp.dot(h1.astype(jnp.bfloat16), w2_ref[0],
                 preferred_element_type=jnp.float32) + b2_ref[0]
    h2 = jnp.maximum(h2, 0.0)

    # ---- residual + layernorm 2 ----
    out = _layernorm(x1 + h2, g2_ref[0], be2_ref[0])
    o_ref[...] = out.reshape(Bt, S, D).astype(o_ref.dtype)


def transformer_encoder(x, params, num_heads, *, batch_tile=None):
    """Full encoder stack forward. x: (B, S, D). params arrays have leading L dim."""
    B, S, D = x.shape
    L = params["wqkv"].shape[0]
    F = params["w1"].shape[-1]
    H = num_heads

    param_order = ["wqkv", "bqkv", "wo", "bo", "g1", "be1", "w1", "b1",
                   "gf", "bf", "w2", "b2", "g2", "be2"]
    per_layer_w_bytes = sum(int(params[n].size * params[n].dtype.itemsize) // L
                            for n in param_order)

    # Physical VMEM (clamp budget so it never exceeds the chip, e.g. 64 MiB on v7x).
    try:
        phys_vmem = int(pltpu.get_tpu_info().vmem_capacity_bytes)
    except Exception:
        phys_vmem = 64 << 20

    def tile_bytes(bt):
        # f32 intermediates + bf16 copies for one batch tile of bt sequences.
        m = bt * S
        act = 2 * bt * S * D * 4                       # x block + resident out block
        qkv = m * 3 * D * (4 + 2)                      # f32 acc + bf16 copy
        scores = 4 * bt * S * S * 4                    # a couple of (S,S) s/p in flight
        ctx = m * D * (4 + 2)                          # per-head ctx list + bf16 copy
        attn_ln = 3 * m * D * 4                        # attn, x1, residual temporaries
        ffn = m * F * (4 + 2) + m * D * 4              # h1 (+bf16) and h2
        return int(1.25 * (act + qkv + scores + ctx + attn_ln + ffn))

    budget = int(0.70 * phys_vmem)
    if batch_tile is None:
        batch_tile = 1
        for bt in range(B, 0, -1):                     # largest divisor of B that fits
            if B % bt == 0 and tile_bytes(bt) + 2 * per_layer_w_bytes + (4 << 20) <= budget:
                batch_tile = bt
                break
    nbt = B // batch_tile

    vmem_limit = tile_bytes(batch_tile) + 2 * per_layer_w_bytes + (8 << 20)
    vmem_limit = int(min(max(vmem_limit, 32 << 20), int(0.85 * phys_vmem)))

    def wspec(name):
        s = params[name].shape
        return pl.BlockSpec((1, s[1], s[2]), lambda b, l: (l, 0, 0))

    in_specs = [pl.BlockSpec((batch_tile, S, D), lambda b, l: (b, 0, 0))]
    in_specs += [wspec(n) for n in param_order]

    # Advisory cost estimate so XLA can schedule around the single fused call.
    flops = int(2 * B * L * S * (4 * D * D + 2 * S * D + 2 * D * F))
    transcendentals = int(B * L * H * S * S)                 # softmax exps
    bytes_accessed = int(2 * B * S * D * 4 + nbt * L * per_layer_w_bytes)
    cost = pl.CostEstimate(flops=flops, transcendentals=transcendentals,
                           bytes_accessed=bytes_accessed)

    kernel = functools.partial(encoder_stack_kernel, num_heads=num_heads)

    return pl.pallas_call(
        kernel,
        out_shape=jax.ShapeDtypeStruct((B, S, D), x.dtype),
        grid_spec=pltpu.PrefetchScalarGridSpec(
            num_scalar_prefetch=0,
            grid=(nbt, L),                               # layer axis last (resident output)
            in_specs=in_specs,
            out_specs=pl.BlockSpec((batch_tile, S, D), lambda b, l: (b, 0, 0)),
        ),
        compiler_params=pltpu.CompilerParams(
            dimension_semantics=("parallel", "arbitrary"),
            vmem_limit_bytes=vmem_limit,
        ),
        cost_estimate=cost,
    )(x, *[params[n] for n in param_order])


def init_params(key, num_layers, d_model, num_heads, ff_d):
    """Weights in bf16 (fused QKV layout), biases / LN params in f32.

    The attention 1/sqrt(head_dim) scale is folded into the q third of wqkv/bqkv.
    """
    hd = d_model // num_heads
    L, D, F = num_layers, d_model, ff_d
    scale = 1.0 / (hd ** 0.5)
    ks = jax.random.split(key, 12)
    wf = lambda k, shape: 0.05 * jax.random.normal(k, shape, jnp.float32)
    bf_ = lambda k, shape: 0.01 * jax.random.normal(k, shape, jnp.float32)

    wq, wk, wv = wf(ks[0], (L, D, D)), wf(ks[1], (L, D, D)), wf(ks[2], (L, D, D))
    bq, bk, bv = bf_(ks[3], (L, 1, D)), bf_(ks[4], (L, 1, D)), bf_(ks[5], (L, 1, D))
    wqkv = jnp.concatenate([wq * scale, wk, wv], axis=-1).astype(jnp.bfloat16)  # (L, D, 3D)
    bqkv = jnp.concatenate([bq * scale, bk, bv], axis=-1)                        # (L, 1, 3D)

    return {
        "wqkv": wqkv,
        "bqkv": bqkv,
        "wo": wf(ks[6], (L, D, D)).astype(jnp.bfloat16),
        "bo": bf_(ks[7], (L, 1, D)),
        "g1": jnp.ones((L, 1, D), jnp.float32),
        "be1": jnp.zeros((L, 1, D), jnp.float32),
        "w1": wf(ks[8], (L, D, F)).astype(jnp.bfloat16),
        "b1": bf_(ks[9], (L, 1, F)),
        "gf": jnp.ones((L, 1, F), jnp.float32),
        "bf": jnp.zeros((L, 1, F), jnp.float32),
        "w2": wf(ks[10], (L, F, D)).astype(jnp.bfloat16),
        "b2": bf_(ks[11], (L, 1, D)),
        "g2": jnp.ones((L, 1, D), jnp.float32),
        "be2": jnp.zeros((L, 1, D), jnp.float32),
    }


if __name__ == "__main__":
    # Small demo shapes consistent with the module: (B, S, d_model).
    # NOTE: production shapes should use d_model / head_dim multiples of 128 and
    # S multiples of 8 for lane/sublane-dense layouts (biggest single perf lever).
    B, S, d_model = 2, 8, 32
    num_heads = 4
    ff_d = 64
    num_layers = 2

    root = jax.random.PRNGKey(0)
    kx, kp = jax.random.split(root)

    x = jax.random.normal(kx, (B, S, d_model), jnp.float32)
    params = init_params(kp, num_layers, d_model, num_heads, ff_d)

    out = transformer_encoder(x, params, num_heads)
    out = jax.block_until_ready(out)
    assert out.shape == (B, S, d_model)
    print("KERNEL_OK")
</pallas_src>

<mosaic_0001>
module attributes {stable_mosaic.version = 11 : i64} {
  func.func @encoder_stack_kernel(%arg0: i32, %arg1: i32, %arg2: memref<2x8x32xf32, #tpu.memory_space<vmem>>, %arg3: memref<1x32x96xbf16, #tpu.memory_space<vmem>>, %arg4: memref<1x1x96xf32, #tpu.memory_space<vmem>>, %arg5: memref<1x32x32xbf16, #tpu.memory_space<vmem>>, %arg6: memref<1x1x32xf32, #tpu.memory_space<vmem>>, %arg7: memref<1x1x32xf32, #tpu.memory_space<vmem>>, %arg8: memref<1x1x32xf32, #tpu.memory_space<vmem>>, %arg9: memref<1x32x64xbf16, #tpu.memory_space<vmem>>, %arg10: memref<1x1x64xf32, #tpu.memory_space<vmem>>, %arg11: memref<1x1x64xf32, #tpu.memory_space<vmem>>, %arg12: memref<1x1x64xf32, #tpu.memory_space<vmem>>, %arg13: memref<1x64x32xbf16, #tpu.memory_space<vmem>>, %arg14: memref<1x1x32xf32, #tpu.memory_space<vmem>>, %arg15: memref<1x1x32xf32, #tpu.memory_space<vmem>>, %arg16: memref<1x1x32xf32, #tpu.memory_space<vmem>>, %arg17: memref<2x8x32xf32, #tpu.memory_space<vmem>>) attributes {dimension_semantics = [#tpu.dimension_semantics<parallel>, #tpu.dimension_semantics<arbitrary>], iteration_bounds = array<i64: 1, 2>, scalar_prefetch = 0 : i64, scratch_operands = 0 : i64, tpu.core_type = #tpu.core_type<tc>, window_params = [{transform_indices = @transform_0, window_bounds = array<i64: 2, 8, 32>}, {transform_indices = @transform_1, window_bounds = array<i64: 1, 32, 96>}, {transform_indices = @transform_2, window_bounds = array<i64: 1, 1, 96>}, {transform_indices = @transform_3, window_bounds = array<i64: 1, 32, 32>}, {transform_indices = @transform_4, window_bounds = array<i64: 1, 1, 32>}, {transform_indices = @transform_5, window_bounds = array<i64: 1, 1, 32>}, {transform_indices = @transform_6, window_bounds = array<i64: 1, 1, 32>}, {transform_indices = @transform_7, window_bounds = array<i64: 1, 32, 64>}, {transform_indices = @transform_8, window_bounds = array<i64: 1, 1, 64>}, {transform_indices = @transform_9, window_bounds = array<i64: 1, 1, 64>}, {transform_indices = @transform_10, window_bounds = array<i64: 1, 1, 64>}, {transform_indices = @transform_11, window_bounds = array<i64: 1, 64, 32>}, {transform_indices = @transform_12, window_bounds = array<i64: 1, 1, 32>}, {transform_indices = @transform_13, window_bounds = array<i64: 1, 1, 32>}, {transform_indices = @transform_14, window_bounds = array<i64: 1, 1, 32>}, {transform_indices = @transform_15, window_bounds = array<i64: 2, 8, 32>}]} {
    %c0_i32 = arith.constant 0 : i32
    %0 = arith.cmpi eq, %arg1, %c0_i32 : i32
    %1 = arith.extui %0 : i1 to i32
    %c0_i32_0 = arith.constant 0 : i32
    %2 = arith.cmpi ne, %1, %c0_i32_0 : i32
    scf.if %2 {
      %c0_84 = arith.constant 0 : index
      %c0_85 = arith.constant 0 : index
      %c0_86 = arith.constant 0 : index
      %194 = vector.load %arg2[%c0_84, %c0_85, %c0_86] : memref<2x8x32xf32, #tpu.memory_space<vmem>>, vector<2x8x32xf32>
      %c0_87 = arith.constant 0 : index
      %c0_88 = arith.constant 0 : index
      %c0_89 = arith.constant 0 : index
      %195 = vector.load %arg17[%c0_87, %c0_88, %c0_89] : memref<2x8x32xf32, #tpu.memory_space<vmem>>, vector<2x8x32xf32>
      tpu.vector_store %arg17[%c0_87, %c0_88, %c0_89], %194 {strides = array<i32>} : memref<2x8x32xf32, #tpu.memory_space<vmem>>, vector<2x8x32xf32>,
    } else {
    }
    %c0 = arith.constant 0 : index
    %c0_1 = arith.constant 0 : index
    %c0_2 = arith.constant 0 : index
    %3 = vector.load %arg17[%c0, %c0_1, %c0_2] : memref<2x8x32xf32, #tpu.memory_space<vmem>>, vector<2x8x32xf32>
    %4 = vector.shape_cast %3 : vector<2x8x32xf32> to vector<16x32xf32>
    %5 = arith.truncf %4 : vector<16x32xf32> to vector<16x32xbf16>
    %c0_3 = arith.constant 0 : index
    %c0_4 = arith.constant 0 : index
    %c0_5 = arith.constant 0 : index
    %6 = vector.load %arg3[%c0_3, %c0_4, %c0_5] : memref<1x32x96xbf16, #tpu.memory_space<vmem>>, vector<1x32x96xbf16>
    %7 = vector.shape_cast %6 : vector<1x32x96xbf16> to vector<32x96xbf16>
    %cst = arith.constant dense<0.000000e+00> : vector<16x96xf32>
    %8 = tpu.matmul %5, %7, %cst {dimension_numbers = #tpu.dot_dimension_numbers<[1], [0], [0], [1], [0, 0, 1, 1], [], []>} : vector<16x32xbf16>, vector<32x96xbf16>, vector<16x96xf32> -> vector<16x96xf32>
    %c0_6 = arith.constant 0 : index
    %c0_7 = arith.constant 0 : index
    %c0_8 = arith.constant 0 : index
    %9 = vector.load %arg4[%c0_6, %c0_7, %c0_8] : memref<1x1x96xf32, #tpu.memory_space<vmem>>, vector<1x1x96xf32>
    %10 = vector.shape_cast %9 : vector<1x1x96xf32> to vector<1x96xf32>
    %11 = vector.broadcast %10 : vector<1x96xf32> to vector<16x96xf32>
    %12 = arith.addf %8, %11 : vector<16x96xf32>
    %13 = arith.truncf %12 : vector<16x96xf32> to vector<16x96xbf16>
    %14 = vector.shape_cast %13 : vector<16x96xbf16> to vector<2x8x96xbf16>
    %15 = vector.extract_strided_slice %14 {offsets = [0, 0, 0], sizes = [2, 8, 32], strides = [1, 1, 1]} : vector<2x8x96xbf16> to vector<2x8x32xbf16>
    %16 = vector.extract_strided_slice %14 {offsets = [0, 0, 32], sizes = [2, 8, 32], strides = [1, 1, 1]} : vector<2x8x96xbf16> to vector<2x8x32xbf16>
    %17 = vector.extract_strided_slice %14 {offsets = [0, 0, 64], sizes = [2, 8, 32], strides = [1, 1, 1]} : vector<2x8x96xbf16> to vector<2x8x32xbf16>
    %18 = vector.extract_strided_slice %15 {offsets = [0, 0, 0], sizes = [2, 8, 8], strides = [1, 1, 1]} : vector<2x8x32xbf16> to vector<2x8x8xbf16>
    %19 = vector.extract_strided_slice %16 {offsets = [0, 0, 0], sizes = [2, 8, 8], strides = [1, 1, 1]} : vector<2x8x32xbf16> to vector<2x8x8xbf16>
    "tpu.trace_start"() <{level = 10 : i32, message = "bqd,bkd->bqk"}> : () -> ()
    %cst_9 = arith.constant dense<0.000000e+00> : vector<2x8x8xf32>
    %20 = tpu.matmul %18, %19, %cst_9 {dimension_numbers = #tpu.dot_dimension_numbers<[2], [2], [1], [1], [0, 0, 0, 1, 1, 1], [0], [0]>} : vector<2x8x8xbf16>, vector<2x8x8xbf16>, vector<2x8x8xf32> -> vector<2x8x8xf32>
    "tpu.trace_stop"() : () -> ()
    %cst_10 = arith.constant dense<0xFF800000> : vector<2x8xf32>
    %21 = vector.multi_reduction <maximumf>, %20, %cst_10 [2] : vector<2x8x8xf32> to vector<2x8xf32>
    %22 = vector.shape_cast %21 : vector<2x8xf32> to vector<2x8x1xf32>
    %23 = vector.broadcast %22 : vector<2x8x1xf32> to vector<2x8x8xf32>
    %24 = arith.subf %20, %23 : vector<2x8x8xf32>
    %25 = math.exp %24 : vector<2x8x8xf32>
    %cst_11 = arith.constant dense<0.000000e+00> : vector<2x8xf32>
    %26 = vector.multi_reduction <add>, %25, %cst_11 [2] : vector<2x8x8xf32> to vector<2x8xf32>
    %27 = vector.shape_cast %26 : vector<2x8xf32> to vector<2x8x1xf32>
    %28 = tpu.reciprocal %27 {approx = true} : vector<2x8x1xf32> -> vector<2x8x1xf32>
    %29 = vector.broadcast %28 : vector<2x8x1xf32> to vector<2x8x8xf32>
    %30 = arith.mulf %25, %29 : vector<2x8x8xf32>
    %31 = arith.truncf %30 : vector<2x8x8xf32> to vector<2x8x8xbf16>
    %32 = vector.extract_strided_slice %17 {offsets = [0, 0, 0], sizes = [2, 8, 8], strides = [1, 1, 1]} : vector<2x8x32xbf16> to vector<2x8x8xbf16>
    "tpu.trace_start"() <{level = 10 : i32, message = "bqk,bkd->bqd"}> : () -> ()
    %cst_12 = arith.constant dense<0.000000e+00> : vector<2x8x8xf32>
    %33 = tpu.matmul %31, %32, %cst_12 {dimension_numbers = #tpu.dot_dimension_numbers<[2], [1], [1], [2], [0, 0, 0, 1, 1, 2], [0], [0]>} : vector<2x8x8xbf16>, vector<2x8x8xbf16>, vector<2x8x8xf32> -> vector<2x8x8xf32>
    "tpu.trace_stop"() : () -> ()
    %34 = vector.extract_strided_slice %15 {offsets = [0, 0, 8], sizes = [2, 8, 8], strides = [1, 1, 1]} : vector<2x8x32xbf16> to vector<2x8x8xbf16>
    %35 = vector.extract_strided_slice %16 {offsets = [0, 0, 8], sizes = [2, 8, 8], strides = [1, 1, 1]} : vector<2x8x32xbf16> to vector<2x8x8xbf16>
    "tpu.trace_start"() <{level = 10 : i32, message = "bqd,bkd->bqk"}> : () -> ()
    %cst_13 = arith.constant dense<0.000000e+00> : vector<2x8x8xf32>
    %36 = tpu.matmul %34, %35, %cst_13 {dimension_numbers = #tpu.dot_dimension_numbers<[2], [2], [1], [1], [0, 0, 0, 1, 1, 1], [0], [0]>} : vector<2x8x8xbf16>, vector<2x8x8xbf16>, vector<2x8x8xf32> -> vector<2x8x8xf32>
    "tpu.trace_stop"() : () -> ()
    %cst_14 = arith.constant dense<0xFF800000> : vector<2x8xf32>
    %37 = vector.multi_reduction <maximumf>, %36, %cst_14 [2] : vector<2x8x8xf32> to vector<2x8xf32>
    %38 = vector.shape_cast %37 : vector<2x8xf32> to vector<2x8x1xf32>
    %39 = vector.broadcast %38 : vector<2x8x1xf32> to vector<2x8x8xf32>
    %40 = arith.subf %36, %39 : vector<2x8x8xf32>
    %41 = math.exp %40 : vector<2x8x8xf32>
    %cst_15 = arith.constant dense<0.000000e+00> : vector<2x8xf32>
    %42 = vector.multi_reduction <add>, %41, %cst_15 [2] : vector<2x8x8xf32> to vector<2x8xf32>
    %43 = vector.shape_cast %42 : vector<2x8xf32> to vector<2x8x1xf32>
    %44 = tpu.reciprocal %43 {approx = true} : vector<2x8x1xf32> -> vector<2x8x1xf32>
    %45 = vector.broadcast %44 : vector<2x8x1xf32> to vector<2x8x8xf32>
    %46 = arith.mulf %41, %45 : vector<2x8x8xf32>
    %47 = arith.truncf %46 : vector<2x8x8xf32> to vector<2x8x8xbf16>
    %48 = vector.extract_strided_slice %17 {offsets = [0, 0, 8], sizes = [2, 8, 8], strides = [1, 1, 1]} : vector<2x8x32xbf16> to vector<2x8x8xbf16>
    "tpu.trace_start"() <{level = 10 : i32, message = "bqk,bkd->bqd"}> : () -> ()
    %cst_16 = arith.constant dense<0.000000e+00> : vector<2x8x8xf32>
    %49 = tpu.matmul %47, %48, %cst_16 {dimension_numbers = #tpu.dot_dimension_numbers<[2], [1], [1], [2], [0, 0, 0, 1, 1, 2], [0], [0]>} : vector<2x8x8xbf16>, vector<2x8x8xbf16>, vector<2x8x8xf32> -> vector<2x8x8xf32>
    "tpu.trace_stop"() : () -> ()
    %50 = vector.extract_strided_slice %15 {offsets = [0, 0, 16], sizes = [2, 8, 8], strides = [1, 1, 1]} : vector<2x8x32xbf16> to vector<2x8x8xbf16>
    %51 = vector.extract_strided_slice %16 {offsets = [0, 0, 16], sizes = [2, 8, 8], strides = [1, 1, 1]} : vector<2x8x32xbf16> to vector<2x8x8xbf16>
    "tpu.trace_start"() <{level = 10 : i32, message = "bqd,bkd->bqk"}> : () -> ()
    %cst_17 = arith.constant dense<0.000000e+00> : vector<2x8x8xf32>
    %52 = tpu.matmul %50, %51, %cst_17 {dimension_numbers = #tpu.dot_dimension_numbers<[2], [2], [1], [1], [0, 0, 0, 1, 1, 1], [0], [0]>} : vector<2x8x8xbf16>, vector<2x8x8xbf16>, vector<2x8x8xf32> -> vector<2x8x8xf32>
    "tpu.trace_stop"() : () -> ()
    %cst_18 = arith.constant dense<0xFF800000> : vector<2x8xf32>
    %53 = vector.multi_reduction <maximumf>, %52, %cst_18 [2] : vector<2x8x8xf32> to vector<2x8xf32>
    %54 = vector.shape_cast %53 : vector<2x8xf32> to vector<2x8x1xf32>
    %55 = vector.broadcast %54 : vector<2x8x1xf32> to vector<2x8x8xf32>
    %56 = arith.subf %52, %55 : vector<2x8x8xf32>
    %57 = math.exp %56 : vector<2x8x8xf32>
    %cst_19 = arith.constant dense<0.000000e+00> : vector<2x8xf32>
    %58 = vector.multi_reduction <add>, %57, %cst_19 [2] : vector<2x8x8xf32> to vector<2x8xf32>
    %59 = vector.shape_cast %58 : vector<2x8xf32> to vector<2x8x1xf32>
    %60 = tpu.reciprocal %59 {approx = true} : vector<2x8x1xf32> -> vector<2x8x1xf32>
    %61 = vector.broadcast %60 : vector<2x8x1xf32> to vector<2x8x8xf32>
    %62 = arith.mulf %57, %61 : vector<2x8x8xf32>
    %63 = arith.truncf %62 : vector<2x8x8xf32> to vector<2x8x8xbf16>
    %64 = vector.extract_strided_slice %17 {offsets = [0, 0, 16], sizes = [2, 8, 8], strides = [1, 1, 1]} : vector<2x8x32xbf16> to vector<2x8x8xbf16>
    "tpu.trace_start"() <{level = 10 : i32, message = "bqk,bkd->bqd"}> : () -> ()
    %cst_20 = arith.constant dense<0.000000e+00> : vector<2x8x8xf32>
    %65 = tpu.matmul %63, %64, %cst_20 {dimension_numbers = #tpu.dot_dimension_numbers<[2], [1], [1], [2], [0, 0, 0, 1, 1, 2], [0], [0]>} : vector<2x8x8xbf16>, vector<2x8x8xbf16>, vector<2x8x8xf32> -> vector<2x8x8xf32>
    "tpu.trace_stop"() : () -> ()
    %66 = vector.extract_strided_slice %15 {offsets = [0, 0, 24], sizes = [2, 8, 8], strides = [1, 1, 1]} : vector<2x8x32xbf16> to vector<2x8x8xbf16>
    %67 = vector.extract_strided_slice %16 {offsets = [0, 0, 24], sizes = [2, 8, 8], strides = [1, 1, 1]} : vector<2x8x32xbf16> to vector<2x8x8xbf16>
    "tpu.trace_start"() <{level = 10 : i32, message = "bqd,bkd->bqk"}> : () -> ()
    %cst_21 = arith.constant dense<0.000000e+00> : vector<2x8x8xf32>
    %68 = tpu.matmul %66, %67, %cst_21 {dimension_numbers = #tpu.dot_dimension_numbers<[2], [2], [1], [1], [0, 0, 0, 1, 1, 1], [0], [0]>} : vector<2x8x8xbf16>, vector<2x8x8xbf16>, vector<2x8x8xf32> -> vector<2x8x8xf32>
    "tpu.trace_stop"() : () -> ()
    %cst_22 = arith.constant dense<0xFF800000> : vector<2x8xf32>
    %69 = vector.multi_reduction <maximumf>, %68, %cst_22 [2] : vector<2x8x8xf32> to vector<2x8xf32>
    %70 = vector.shape_cast %69 : vector<2x8xf32> to vector<2x8x1xf32>
    %71 = vector.broadcast %70 : vector<2x8x1xf32> to vector<2x8x8xf32>
    %72 = arith.subf %68, %71 : vector<2x8x8xf32>
    %73 = math.exp %72 : vector<2x8x8xf32>
    %cst_23 = arith.constant dense<0.000000e+00> : vector<2x8xf32>
    %74 = vector.multi_reduction <add>, %73, %cst_23 [2] : vector<2x8x8xf32> to vector<2x8xf32>
    %75 = vector.shape_cast %74 : vector<2x8xf32> to vector<2x8x1xf32>
    %76 = tpu.reciprocal %75 {approx = true} : vector<2x8x1xf32> -> vector<2x8x1xf32>
    %77 = vector.broadcast %76 : vector<2x8x1xf32> to vector<2x8x8xf32>
    %78 = arith.mulf %73, %77 : vector<2x8x8xf32>
    %79 = arith.truncf %78 : vector<2x8x8xf32> to vector<2x8x8xbf16>
    %80 = vector.extract_strided_slice %17 {offsets = [0, 0, 24], sizes = [2, 8, 8], strides = [1, 1, 1]} : vector<2x8x32xbf16> to vector<2x8x8xbf16>
    "tpu.trace_start"() <{level = 10 : i32, message = "bqk,bkd->bqd"}> : () -> ()
    %cst_24 = arith.constant dense<0.000000e+00> : vector<2x8x8xf32>
    %81 = tpu.matmul %79, %80, %cst_24 {dimension_numbers = #tpu.dot_dimension_numbers<[2], [1], [1], [2], [0, 0, 0, 1, 1, 2], [0], [0]>} : vector<2x8x8xbf16>, vector<2x8x8xbf16>, vector<2x8x8xf32> -> vector<2x8x8xf32>
    "tpu.trace_stop"() : () -> ()
    %82 = tpu.concatenate %33, %49, %65, %81 in 2 : vector<2x8x8xf32>, vector<2x8x8xf32>, vector<2x8x8xf32>, vector<2x8x8xf32> -> vector<2x8x32xf32>
    %83 = arith.truncf %82 : vector<2x8x32xf32> to vector<2x8x32xbf16>
    %84 = vector.shape_cast %83 : vector<2x8x32xbf16> to vector<16x32xbf16>
    %c0_25 = arith.constant 0 : index
    %c0_26 = arith.constant 0 : index
    %c0_27 = arith.constant 0 : index
    %85 = vector.load %arg5[%c0_25, %c0_26, %c0_27] : memref<1x32x32xbf16, #tpu.memory_space<vmem>>, vector<1x32x32xbf16>
    %86 = vector.shape_cast %85 : vector<1x32x32xbf16> to vector<32x32xbf16>
    %cst_28 = arith.constant dense<0.000000e+00> : vector<16x32xf32>
    %87 = tpu.matmul %84, %86, %cst_28 {dimension_numbers = #tpu.dot_dimension_numbers<[1], [0], [0], [1], [0, 0, 1, 1], [], []>} : vector<16x32xbf16>, vector<32x32xbf16>, vector<16x32xf32> -> vector<16x32xf32>
    %c0_29 = arith.constant 0 : index
    %c0_30 = arith.constant 0 : index
    %c0_31 = arith.constant 0 : index
    %88 = vector.load %arg6[%c0_29, %c0_30, %c0_31] : memref<1x1x32xf32, #tpu.memory_space<vmem>>, vector<1x1x32xf32>
    %89 = vector.shape_cast %88 : vector<1x1x32xf32> to vector<1x32xf32>
    %90 = vector.broadcast %89 : vector<1x32xf32> to vector<16x32xf32>
    %91 = arith.addf %87, %90 : vector<16x32xf32>
    %92 = arith.addf %4, %91 : vector<16x32xf32>
    %c0_32 = arith.constant 0 : index
    %c0_33 = arith.constant 0 : index
    %c0_34 = arith.constant 0 : index
    %93 = vector.load %arg7[%c0_32, %c0_33, %c0_34] : memref<1x1x32xf32, #tpu.memory_space<vmem>>, vector<1x1x32xf32>
    %94 = vector.shape_cast %93 : vector<1x1x32xf32> to vector<1x32xf32>
    %c0_35 = arith.constant 0 : index
    %c0_36 = arith.constant 0 : index
    %c0_37 = arith.constant 0 : index
    %95 = vector.load %arg8[%c0_35, %c0_36, %c0_37] : memref<1x1x32xf32, #tpu.memory_space<vmem>>, vector<1x1x32xf32>
    %96 = vector.shape_cast %95 : vector<1x1x32xf32> to vector<1x32xf32>
    %cst_38 = arith.constant dense<0.000000e+00> : vector<16xf32>
    %97 = vector.multi_reduction <add>, %92, %cst_38 [1] : vector<16x32xf32> to vector<16xf32>
    %98 = vector.shape_cast %97 : vector<16xf32> to vector<16x1xf32>
    %cst_39 = arith.constant 3.200000e+01 : f32
    %99 = vector.broadcast %cst_39 : f32 to vector<16x1xf32>
    %100 = arith.divf %98, %99 : vector<16x1xf32>
    %101 = vector.broadcast %100 : vector<16x1xf32> to vector<16x32xf32>
    %102 = arith.subf %92, %101 : vector<16x32xf32>
    %103 = arith.mulf %102, %102 : vector<16x32xf32>
    %cst_40 = arith.constant dense<0.000000e+00> : vector<16xf32>
    %104 = vector.multi_reduction <add>, %103, %cst_40 [1] : vector<16x32xf32> to vector<16xf32>
    %105 = vector.shape_cast %104 : vector<16xf32> to vector<16x1xf32>
    %cst_41 = arith.constant 3.200000e+01 : f32
    %106 = vector.broadcast %cst_41 : f32 to vector<16x1xf32>
    %107 = arith.divf %105, %106 : vector<16x1xf32>
    %108 = vector.broadcast %100 : vector<16x1xf32> to vector<16x32xf32>
    %109 = arith.subf %92, %108 : vector<16x32xf32>
    %cst_42 = arith.constant 9.99999974E-6 : f32
    %110 = vector.broadcast %cst_42 : f32 to vector<16x1xf32>
    %111 = arith.addf %107, %110 : vector<16x1xf32>
    %112 = math.rsqrt %111 : vector<16x1xf32>
    %113 = vector.broadcast %112 : vector<16x1xf32> to vector<16x32xf32>
    %114 = arith.mulf %109, %113 : vector<16x32xf32>
    %115 = vector.broadcast %94 : vector<1x32xf32> to vector<16x32xf32>
    %116 = arith.mulf %114, %115 : vector<16x32xf32>
    %117 = vector.broadcast %96 : vector<1x32xf32> to vector<16x32xf32>
    %118 = arith.addf %116, %117 : vector<16x32xf32>
    %119 = arith.truncf %118 : vector<16x32xf32> to vector<16x32xbf16>
    %c0_43 = arith.constant 0 : index
    %c0_44 = arith.constant 0 : index
    %c0_45 = arith.constant 0 : index
    %120 = vector.load %arg9[%c0_43, %c0_44, %c0_45] : memref<1x32x64xbf16, #tpu.memory_space<vmem>>, vector<1x32x64xbf16>
    %121 = vector.shape_cast %120 : vector<1x32x64xbf16> to vector<32x64xbf16>
    %cst_46 = arith.constant dense<0.000000e+00> : vector<16x64xf32>
    %122 = tpu.matmul %119, %121, %cst_46 {dimension_numbers = #tpu.dot_dimension_numbers<[1], [0], [0], [1], [0, 0, 1, 1], [], []>} : vector<16x32xbf16>, vector<32x64xbf16>, vector<16x64xf32> -> vector<16x64xf32>
    %c0_47 = arith.constant 0 : index
    %c0_48 = arith.constant 0 : index
    %c0_49 = arith.constant 0 : index
    %123 = vector.load %arg10[%c0_47, %c0_48, %c0_49] : memref<1x1x64xf32, #tpu.memory_space<vmem>>, vector<1x1x64xf32>
    %124 = vector.shape_cast %123 : vector<1x1x64xf32> to vector<1x64xf32>
    %125 = vector.broadcast %124 : vector<1x64xf32> to vector<16x64xf32>
    %126 = arith.addf %122, %125 : vector<16x64xf32>
    %cst_50 = arith.constant 0.000000e+00 : f32
    %127 = vector.broadcast %cst_50 : f32 to vector<16x64xf32>
    %128 = arith.maximumf %126, %127 : vector<16x64xf32>
    %c0_51 = arith.constant 0 : index
    %c0_52 = arith.constant 0 : index
    %c0_53 = arith.constant 0 : index
    %129 = vector.load %arg11[%c0_51, %c0_52, %c0_53] : memref<1x1x64xf32, #tpu.memory_space<vmem>>, vector<1x1x64xf32>
    %130 = vector.shape_cast %129 : vector<1x1x64xf32> to vector<1x64xf32>
    %c0_54 = arith.constant 0 : index
    %c0_55 = arith.constant 0 : index
    %c0_56 = arith.constant 0 : index
    %131 = vector.load %arg12[%c0_54, %c0_55, %c0_56] : memref<1x1x64xf32, #tpu.memory_space<vmem>>, vector<1x1x64xf32>
    %132 = vector.shape_cast %131 : vector<1x1x64xf32> to vector<1x64xf32>
    %cst_57 = arith.constant dense<0.000000e+00> : vector<16xf32>
    %133 = vector.multi_reduction <add>, %128, %cst_57 [1] : vector<16x64xf32> to vector<16xf32>
    %134 = vector.shape_cast %133 : vector<16xf32> to vector<16x1xf32>
    %cst_58 = arith.constant 6.400000e+01 : f32
    %135 = vector.broadcast %cst_58 : f32 to vector<16x1xf32>
    %136 = arith.divf %134, %135 : vector<16x1xf32>
    %137 = vector.broadcast %136 : vector<16x1xf32> to vector<16x64xf32>
    %138 = arith.subf %128, %137 : vector<16x64xf32>
    %139 = arith.mulf %138, %138 : vector<16x64xf32>
    %cst_59 = arith.constant dense<0.000000e+00> : vector<16xf32>
    %140 = vector.multi_reduction <add>, %139, %cst_59 [1] : vector<16x64xf32> to vector<16xf32>
    %141 = vector.shape_cast %140 : vector<16xf32> to vector<16x1xf32>
    %cst_60 = arith.constant 6.400000e+01 : f32
    %142 = vector.broadcast %cst_60 : f32 to vector<16x1xf32>
    %143 = arith.divf %141, %142 : vector<16x1xf32>
    %144 = vector.broadcast %136 : vector<16x1xf32> to vector<16x64xf32>
    %145 = arith.subf %128, %144 : vector<16x64xf32>
    %cst_61 = arith.constant 9.99999974E-6 : f32
    %146 = vector.broadcast %cst_61 : f32 to vector<16x1xf32>
    %147 = arith.addf %143, %146 : vector<16x1xf32>
    %148 = math.rsqrt %147 : vector<16x1xf32>
    %149 = vector.broadcast %148 : vector<16x1xf32> to vector<16x64xf32>
    %150 = arith.mulf %145, %149 : vector<16x64xf32>
    %151 = vector.broadcast %130 : vector<1x64xf32> to vector<16x64xf32>
    %152 = arith.mulf %150, %151 : vector<16x64xf32>
    %153 = vector.broadcast %132 : vector<1x64xf32> to vector<16x64xf32>
    %154 = arith.addf %152, %153 : vector<16x64xf32>
    %155 = arith.truncf %154 : vector<16x64xf32> to vector<16x64xbf16>
    %c0_62 = arith.constant 0 : index
    %c0_63 = arith.constant 0 : index
    %c0_64 = arith.constant 0 : index
    %156 = vector.load %arg13[%c0_62, %c0_63, %c0_64] : memref<1x64x32xbf16, #tpu.memory_space<vmem>>, vector<1x64x32xbf16>
    %157 = vector.shape_cast %156 : vector<1x64x32xbf16> to vector<64x32xbf16>
    %cst_65 = arith.constant dense<0.000000e+00> : vector<16x32xf32>
    %158 = tpu.matmul %155, %157, %cst_65 {dimension_numbers = #tpu.dot_dimension_numbers<[1], [0], [0], [1], [0, 0, 1, 1], [], []>} : vector<16x64xbf16>, vector<64x32xbf16>, vector<16x32xf32> -> vector<16x32xf32>
    %c0_66 = arith.constant 0 : index
    %c0_67 = arith.constant 0 : index
    %c0_68 = arith.constant 0 : index
    %159 = vector.load %arg14[%c0_66, %c0_67, %c0_68] : memref<1x1x32xf32, #tpu.memory_space<vmem>>, vector<1x1x32xf32>
    %160 = vector.shape_cast %159 : vector<1x1x32xf32> to vector<1x32xf32>
    %161 = vector.broadcast %160 : vector<1x32xf32> to vector<16x32xf32>
    %162 = arith.addf %158, %161 : vector<16x32xf32>
    %cst_69 = arith.constant 0.000000e+00 : f32
    %163 = vector.broadcast %cst_69 : f32 to vector<16x32xf32>
    %164 = arith.maximumf %162, %163 : vector<16x32xf32>
    %165 = arith.addf %118, %164 : vector<16x32xf32>
    %c0_70 = arith.constant 0 : index
    %c0_71 = arith.constant 0 : index
    %c0_72 = arith.constant 0 : index
    %166 = vector.load %arg15[%c0_70, %c0_71, %c0_72] : memref<1x1x32xf32, #tpu.memory_space<vmem>>, vector<1x1x32xf32>
    %167 = vector.shape_cast %166 : vector<1x1x32xf32> to vector<1x32xf32>
    %c0_73 = arith.constant 0 : index
    %c0_74 = arith.constant 0 : index
    %c0_75 = arith.constant 0 : index
    %168 = vector.load %arg16[%c0_73, %c0_74, %c0_75] : memref<1x1x32xf32, #tpu.memory_space<vmem>>, vector<1x1x32xf32>
    %169 = vector.shape_cast %168 : vector<1x1x32xf32> to vector<1x32xf32>
    %cst_76 = arith.constant dense<0.000000e+00> : vector<16xf32>
    %170 = vector.multi_reduction <add>, %165, %cst_76 [1] : vector<16x32xf32> to vector<16xf32>
    %171 = vector.shape_cast %170 : vector<16xf32> to vector<16x1xf32>
    %cst_77 = arith.constant 3.200000e+01 : f32
    %172 = vector.broadcast %cst_77 : f32 to vector<16x1xf32>
    %173 = arith.divf %171, %172 : vector<16x1xf32>
    %174 = vector.broadcast %173 : vector<16x1xf32> to vector<16x32xf32>
    %175 = arith.subf %165, %174 : vector<16x32xf32>
    %176 = arith.mulf %175, %175 : vector<16x32xf32>
    %cst_78 = arith.constant dense<0.000000e+00> : vector<16xf32>
    %177 = vector.multi_reduction <add>, %176, %cst_78 [1] : vector<16x32xf32> to vector<16xf32>
    %178 = vector.shape_cast %177 : vector<16xf32> to vector<16x1xf32>
    %cst_79 = arith.constant 3.200000e+01 : f32
    %179 = vector.broadcast %cst_79 : f32 to vector<16x1xf32>
    %180 = arith.divf %178, %179 : vector<16x1xf32>
    %181 = vector.broadcast %173 : vector<16x1xf32> to vector<16x32xf32>
    %182 = arith.subf %165, %181 : vector<16x32xf32>
    %cst_80 = arith.constant 9.99999974E-6 : f32
    %183 = vector.broadcast %cst_80 : f32 to vector<16x1xf32>
    %184 = arith.addf %180, %183 : vector<16x1xf32>
    %185 = math.rsqrt %184 : vector<16x1xf32>
    %186 = vector.broadcast %185 : vector<16x1xf32> to vector<16x32xf32>
    %187 = arith.mulf %182, %186 : vector<16x32xf32>
    %188 = vector.broadcast %167 : vector<1x32xf32> to vector<16x32xf32>
    %189 = arith.mulf %187, %188 : vector<16x32xf32>
    %190 = vector.broadcast %169 : vector<1x32xf32> to vector<16x32xf32>
    %191 = arith.addf %189, %190 : vector<16x32xf32>
    %192 = vector.shape_cast %191 : vector<16x32xf32> to vector<2x8x32xf32>
    %c0_81 = arith.constant 0 : index
    %c0_82 = arith.constant 0 : index
    %c0_83 = arith.constant 0 : index
    %193 = vector.load %arg17[%c0_81, %c0_82, %c0_83] : memref<2x8x32xf32, #tpu.memory_space<vmem>>, vector<2x8x32xf32>
    tpu.vector_store %arg17[%c0_81, %c0_82, %c0_83], %192 {strides = array<i32>} : memref<2x8x32xf32, #tpu.memory_space<vmem>>, vector<2x8x32xf32>,
    return
  }
  func.func @transform_0(%arg0: i32, %arg1: i32) -> (i32, i32, i32) {
    %c0_i32 = arith.constant 0 : i32
    %c0_i32_0 = arith.constant 0 : i32
    %c0_i32_1 = arith.constant 0 : i32
    return %arg0, %c0_i32, %c0_i32_0 : i32, i32, i32
  }
  func.func @transform_1(%arg0: i32, %arg1: i32) -> (i32, i32, i32) {
    %c0_i32 = arith.constant 0 : i32
    %c0_i32_0 = arith.constant 0 : i32
    %c0_i32_1 = arith.constant 0 : i32
    return %arg1, %c0_i32, %c0_i32_0 : i32, i32, i32
  }
  func.func @transform_2(%arg0: i32, %arg1: i32) -> (i32, i32, i32) {
    %c0_i32 = arith.constant 0 : i32
    %c0_i32_0 = arith.constant 0 : i32
    %c0_i32_1 = arith.constant 0 : i32
    return %arg1, %c0_i32, %c0_i32_0 : i32, i32, i32
  }
  func.func @transform_3(%arg0: i32, %arg1: i32) -> (i32, i32, i32) {
    %c0_i32 = arith.constant 0 : i32
    %c0_i32_0 = arith.constant 0 : i32
    %c0_i32_1 = arith.constant 0 : i32
    return %arg1, %c0_i32, %c0_i32_0 : i32, i32, i32
  }
  func.func @transform_4(%arg0: i32, %arg1: i32) -> (i32, i32, i32) {
    %c0_i32 = arith.constant 0 : i32
    %c0_i32_0 = arith.constant 0 : i32
    %c0_i32_1 = arith.constant 0 : i32
    return %arg1, %c0_i32, %c0_i32_0 : i32, i32, i32
  }
  func.func @transform_5(%arg0: i32, %arg1: i32) -> (i32, i32, i32) {
    %c0_i32 = arith.constant 0 : i32
    %c0_i32_0 = arith.constant 0 : i32
    %c0_i32_1 = arith.constant 0 : i32
    return %arg1, %c0_i32, %c0_i32_0 : i32, i32, i32
  }
  func.func @transform_6(%arg0: i32, %arg1: i32) -> (i32, i32, i32) {
    %c0_i32 = arith.constant 0 : i32
    %c0_i32_0 = arith.constant 0 : i32
    %c0_i32_1 = arith.constant 0 : i32
    return %arg1, %c0_i32, %c0_i32_0 : i32, i32, i32
  }
  func.func @transform_7(%arg0: i32, %arg1: i32) -> (i32, i32, i32) {
    %c0_i32 = arith.constant 0 : i32
    %c0_i32_0 = arith.constant 0 : i32
    %c0_i32_1 = arith.constant 0 : i32
    return %arg1, %c0_i32, %c0_i32_0 : i32, i32, i32
  }
  func.func @transform_8(%arg0: i32, %arg1: i32) -> (i32, i32, i32) {
    %c0_i32 = arith.constant 0 : i32
    %c0_i32_0 = arith.constant 0 : i32
    %c0_i32_1 = arith.constant 0 : i32
    return %arg1, %c0_i32, %c0_i32_0 : i32, i32, i32
  }
  func.func @transform_9(%arg0: i32, %arg1: i32) -> (i32, i32, i32) {
    %c0_i32 = arith.constant 0 : i32
    %c0_i32_0 = arith.constant 0 : i32
    %c0_i32_1 = arith.constant 0 : i32
    return %arg1, %c0_i32, %c0_i32_0 : i32, i32, i32
  }
  func.func @transform_10(%arg0: i32, %arg1: i32) -> (i32, i32, i32) {
    %c0_i32 = arith.constant 0 : i32
    %c0_i32_0 = arith.constant 0 : i32
    %c0_i32_1 = arith.constant 0 : i32
    return %arg1, %c0_i32, %c0_i32_0 : i32, i32, i32
  }
  func.func @transform_11(%arg0: i32, %arg1: i32) -> (i32, i32, i32) {
    %c0_i32 = arith.constant 0 : i32
    %c0_i32_0 = arith.constant 0 : i32
    %c0_i32_1 = arith.constant 0 : i32
    return %arg1, %c0_i32, %c0_i32_0 : i32, i32, i32
  }
  func.func @transform_12(%arg0: i32, %arg1: i32) -> (i32, i32, i32) {
    %c0_i32 = arith.constant 0 : i32
    %c0_i32_0 = arith.constant 0 : i32
    %c0_i32_1 = arith.constant 0 : i32
    return %arg1, %c0_i32, %c0_i32_0 : i32, i32, i32
  }
  func.func @transform_13(%arg0: i32, %arg1: i32) -> (i32, i32, i32) {
    %c0_i32 = arith.constant 0 : i32
    %c0_i32_0 = arith.constant 0 : i32
    %c0_i32_1 = arith.constant 0 : i32
    return %arg1, %c0_i32, %c0_i32_0 : i32, i32, i32
  }
  func.func @transform_14(%arg0: i32, %arg1: i32) -> (i32, i32, i32) {
    %c0_i32 = arith.constant 0 : i32
    %c0_i32_0 = arith.constant 0 : i32
    %c0_i32_1 = arith.constant 0 : i32
    return %arg1, %c0_i32, %c0_i32_0 : i32, i32, i32
  }
  func.func @transform_15(%arg0: i32, %arg1: i32) -> (i32, i32, i32) {
    %c0_i32 = arith.constant 0 : i32
    %c0_i32_0 = arith.constant 0 : i32
    %c0_i32_1 = arith.constant 0 : i32
    return %arg0, %c0_i32, %c0_i32_0 : i32, i32, i32
  }
}

</mosaic_0001>

<bundles_post_ra>
// kernel: tpu_custom_call.1
= control target key start
LH: loop header
LB: loop body
LE: loop exit
PB: predicated region body
PF: predicated region fallthrough
CT: control target
= control target key end

     0   :  { %s3671_s0 = inlined_call_operand.hbm [shape: f32[2,8,32], index: 0, kind: input, shape index: {}]   ;;  %s3672_s1 = inlined_call_operand.vmem [shape: bf16[2,32,96], index: 1, kind: input, shape index: {}]   ;;  %s3673_s2 = inlined_call_operand.vmem [shape: f32[2,1,96], index: 2, kind: input, shape index: {}]   ;;  %s3674_s3 = inlined_call_operand.vmem [shape: bf16[2,32,32], index: 3, kind: input, shape index: {}]   ;;  %s3675_s4 = inlined_call_operand.vmem [shape: f32[2,1,32], index: 4, kind: input, shape index: {}]   ;;  %s3676_s5 = inlined_call_operand.vmem [shape: f32[2,1,32], index: 5, kind: input, shape index: {}]   ;;  %s3677_s6 = inlined_call_operand.vmem [shape: f32[2,1,32], index: 6, kind: input, shape index: {}]   ;;  %s3678_s7 = inlined_call_operand.vmem [shape: bf16[2,32,64], index: 7, kind: input, shape index: {}]   ;;  %s3679_s8 = inlined_call_operand.hbm [shape: f32[2,1,64], index: 8, kind: input, shape index: {}]   ;;  %s3680_s9 = inlined_call_operand.hbm [shape: f32[2,1,64], index: 9, kind: input, shape index: {}]   ;;  %s3681_s10 = inlined_call_operand.hbm [shape: f32[2,1,64], index: 10, kind: input, shape index: {}]   ;;  %s3682_s11 = inlined_call_operand.vmem [shape: bf16[2,64,32], index: 11, kind: input, shape index: {}]   ;;  %s3683_s12 = inlined_call_operand.vmem [shape: f32[2,1,32], index: 12, kind: input, shape index: {}]   ;;  %s3684_s13 = inlined_call_operand.vmem [shape: f32[2,1,32], index: 13, kind: input, shape index: {}]   ;;  %s3685_s14 = inlined_call_operand.vmem [shape: f32[2,1,32], index: 14, kind: input, shape index: {}]   ;;  %s3686_s15 = inlined_call_operand.hbm [shape: f32[2,8,32], index: 15, kind: output, shape index: {}]  }
   0x1   :  { %3699 = sst [smem:[#allocation20_spill]] %s3671_s0 }
   0x2   :  { %3700 = sst [smem:[#allocation21_spill]] %s3672_s1 }
   0x3   :  { %3701 = sst [smem:[#allocation22_spill]] %s3674_s3 }
   0x4   :  { %3702 = sst [smem:[#allocation23_spill]] %s3676_s5 }
   0x5   :  { %3703 = sst [smem:[#allocation24_spill]] %s3677_s6 }
   0x6   :  { %3704 = sst [smem:[#allocation25_spill]] %s3678_s7 }
   0x7   :  { %3705 = sst [smem:[#allocation26_spill]] %s3679_s8 }
   0x8   :  { %3706 = sst [smem:[#allocation27_spill]] %s3680_s9 }
   0x9   :  { %3707 = sst [smem:[#allocation28_spill]] %s3681_s10 }
   0xa   :  { %3708 = sst [smem:[#allocation29_spill]] %s3682_s11 }
   0xb   :  { %3709 = sst [smem:[#allocation30_spill]] %s3683_s12 }
   0xc   :  { %3710 = sst [smem:[#allocation31_spill]] %s3684_s13 }
   0xd   :  { %3711 = sst [smem:[#allocation32_spill]] %s3685_s14 }
   0xe   :  { %3712 = sst [smem:[#allocation33_spill]] %s3686_s15 }
   0xf   :  { %20 = vsyncpa [#allocation3], 0 }
  0x10   :  { %21 = vsyncpa [#allocation6], 0 }
  0x11   :  { %23 = vsyncpa [#allocation6 + $0x1], 0 }
  0x12   :  { %24 = vsyncpa [#allocation9], 0 }
  0x13   :  { %26 = vsyncpa [#allocation9 + $0x1], 0 }
  0x14   :  { %27 = vsyncpa [#allocation4], 0  ;;  %s3113_s18 = smov 0   ;;  %s3115_s19 = smov 0  }
  0x15   :  { %s3117_s20 = smov 0   ;;  %s3119_s21 = smov 0  }
  0x16   :  { %s3121_s22 = smov 0   ;;  %s3123_s23 = smov 0  }
  0x17 LB: > { %3713 = sst [smem:[#allocation15_spill]] %s2995_s20  ;;  %s42_s24 = sadd.s32 1, %s3003_s22  ;;  %s3007_s23 = sphi %s3123_s23, %s33_s23   ;;  %s3003_s22 = sphi %s3121_s22, %s3759_s22   ;;  %s2999_s21 = sphi %s3119_s21, %s3758_s21   ;;  %s2995_s20 = sphi %s3117_s20, %s3757_s20   ;;  %s2991_s19 = sphi %s3115_s19, %s3761_s19   ;;  %s2987_s18 = sphi %s3113_s18, %s3760_s18  }
  0x18   : > { %3714 = sst [smem:[#allocation16_spill]] %s3003_s22  ;;  %s260_s25 = sadd.s32 1, %s2995_s20 }
  0x19   : > { %3715 = sst [smem:[#allocation17_spill]] %s3007_s23  ;;  %p43_p0 = scmp.ge.s32.totalorder %s42_s24, 2 }
  0x1a   : > { %p267_p1 = scmp.ne.s32.totalorder %s2995_s20, %s2991_s19  ;;  %p268_p2 = scmp.eq.s32.totalorder %s3007_s23, 0 }
  0x1b   : > { %s3763_s24 = smov (%p43_p0, %s42_s24), 0  ;;  %p2659_p4 = scmp.lt.s32.totalorder %s3007_s23, 2 }
  0x1c   : > { %3716 = sst [smem:[#allocation18_spill]] %s3763_s24  ;;  %p269_p3 = por %p268_p2, %p267_p1 }
  0x1d   : > { %s257_s26 = ssub.s32 %s3003_s22, %s3763_s24  ;;  %s543_s27 = sand.u32 1, %s3007_s23  }
  0x1e   : > { %p258_p5 = scmp.eq.s32.totalorder %s257_s26, 0  ;;  %s3155_s28 = sand.u32 1, %s2995_s20  }
  0x1f   : > { %s3158_s29 = sshll.u32 %s3003_s22, 4  ;;  %s3718_s8 = sld [smem:[#allocation26_spill]] }
  0x20   : > { %s3161_s30 = scalar_select %p258_p5, %s2995_s20, %s260_s25  }
  0x21   : > { %s546_s24 = scalar_lea.vmem [#allocation5], %s3155_s28  ;;  %p3170_p6 = pnand %p2659_p4, %p269_p3 }
  0x22   : > { %3717 = sst [smem:[#allocation19_spill]] %s3161_s30  ;;  %s553_s14 = sshll.u32 %s546_s24, 4  ;;  %s3174_s14 = int_to_ptr.vmem [resolvable:$true] %s553_s14 }
  0x23   : > { %s3719_s26 = scalar_select %p3170_p6, 1, 0 }
  0x24   : > { %s3176_s25 = scalar_lea.sflag [#allocation6], %s543_s27  ;;  %p3182_p8 = pneg %p3170_p6 }
  0x25   : > { %s3167_s15 = scalar_lea.hbm %s3718_s8, %s3158_s29  ;;  %s2806_s30 = scalar_lea.hbm %s3718_s8, 32 }
  0x26   : > { %s2801_s22 = scalar_lea.hbm %s3167_s15, 16  ;;  %p2807_p11 = scmp.lt.u32.totalorder %s3167_s15, %s3718_s8 }
  0x27   : > { %p2802_p7 = scmp.ne.s32.totalorder %s3167_s15, %s2801_s22  ;;  %p2808_p12 = scmp.lt.u32.totalorder %s2806_s30, %s2801_s22 }
  0x28   : > { %s3720_s16 = scalar_select %p3182_p8, 1, 0 }
  0x29   : > { %p2804_p9 = pnand %p3182_p8, %p2802_p7  ;;  %p2809_p13 = por %p2808_p12, %p2807_p11 }
  0x2a   : > { %p2810_p0 = scmp.lt.u32.totalorder %s2801_s22, %s3167_s15 }
  0x2b   : > { %p2805_p10 = pneg %p2804_p9 }
  0x2c   : > { %p2811_p1 = por %p2810_p0, %p2809_p13 }
  0x2e   : > { %p2812_p2 = pnand %p2811_p1, %p2805_p10 }
  0x30   : > { %2815 = shalt.err (!%p2812_p2)
}
  0x31   : > { %s2816_s27 = scalar_lea.vmem %s3174_s14, 16  ;;  %s3009_s24 = smov [#allocation5]  }
  0x32   : > { %p2817_p3 = scmp.ne.s32.totalorder %s3174_s14, %s2816_s27  ;;  %s2821_s17 = sshll.u32 %s3009_s24, 4  ;;  %s2822_s17 = int_to_ptr.vmem [resolvable:$false] %s2821_s17 }
  0x33   : > { %s2823_s13 = scalar_lea.vmem %s2822_s17, 32  ;;  %p2824_p7 = scmp.lt.s32.totalorder %s3174_s14, %s2822_s17 }
  0x34   : > { %p2819_p4 = pnand %p2817_p3, %p3182_p8  ;;  %p2825_p9 = scmp.lt.s32.totalorder %s2823_s13, %s2816_s27 }
  0x36   : > { %p2820_p5 = pneg %p2819_p4  ;;  %p2826_p11 = por %p2825_p9, %p2824_p7 }
  0x38   : > { %p2827_p12 = pnand %p2826_p11, %p2820_p5 }
  0x3a   : > { %2830 = shalt.err (!%p2827_p12)
}
  0x3b   : > { %2651 = dma.hbm_to_vmem [thread:$0]  (!%p3170_p6), %s3167_s15, 16, %s3174_s14, %s3176_s25  }
  0x3c   : > { %s3207_s20 = sadd.s32 4294967295, %s3007_s23   ;;  %p273_p10 = scmp.ne.s32.totalorder %s2991_s19, %s2987_s18 }
  0x3d   : > { %p3692_p13 = scmp.eq.s32.totalorder %s3207_s20, 0  ;;  %p2381_p0 = scmp.ge.s32.totalorder %s3007_s23, 1 }
  0x3e   : > { %p466_p1 = scmp.lt.s32.totalorder %s3007_s23, 3  ;;  %s3010_s14 = smov [#allocation2]  }
  0x3f   : > { %p3216_p2 = por %p3692_p13, %p273_p10  ;;  %s481_s15 = sshll.u32 %s3010_s14, 4  ;;  %s3224_s15 = int_to_ptr.vmem [resolvable:$true] %s481_s15 }
  0x40   : > { %p3220_p3 = pnand %p2381_p0, %p466_p1  ;;  %s3723_s9 = sld [smem:[#allocation27_spill]] }
  0x41   : > { %s3721_s22 = scalar_select %p3216_p2, 1, 0 }
  0x42   : > { %s3722_s30 = scalar_select %p3220_p3, 1, 0 }
  0x43   : > { %p2644_p4 = pneg %p3220_p3  ;;  %s563_s13 = scalar_lea.vmem [#allocation7], %s3155_s28 }
  0x44   : > { %s570_s8 = sshll.u32 %s563_s13, 4  ;;  %s3725_s0 = sld [smem:[#allocation20_spill]]  ;;  %s3241_s8 = int_to_ptr.vmem [resolvable:$true] %s570_s8 }
  0x45   : > { %p3236_p5 = pnand %p2644_p4, %p3692_p13 }
  0x46   : > { %s3232_s24 = scalar_lea.hbm %s3723_s9, %s3158_s29 }
  0x47   : > { %p2833_p9 = pneg %p3236_p5 }
  0x4a   : > { %s2831_s11 = scalar_lea.hbm %s3725_s0, 256 }
  0x4b   : > { %p2832_p7 = scmp.ne.s32.totalorder %s3725_s0, %s2831_s11  ;;  %p2838_p10 = scmp.lt.u32.totalorder %s2831_s11, %s3725_s0 }
  0x4d   : > { %p2834_p11 = pnand %p2833_p9, %p2832_p7 }
  0x4f   : > { %p2835_p12 = pneg %p2834_p11 }
  0x51   : > { %p2840_p0 = pnand %p2838_p10, %p2835_p12 }
  0x53   : > { %2843 = shalt.err (!%p2840_p0)
}
  0x54   : > { %s2844_s13 = scalar_lea.vmem %s3224_s15, 256  ;;  %p2852_p2 = scmp.lt.s32.totalorder %s3224_s15, %s3224_s15 }
  0x55   : > { %p2845_p1 = scmp.ne.s32.totalorder %s3224_s15, %s2844_s13  ;;  %p2853_p3 = scmp.lt.s32.totalorder %s2844_s13, %s2844_s13 }
  0x57   : > { %p2847_p4 = pnand %p2845_p1, %p2833_p9  ;;  %p2854_p6 = por %p2853_p3, %p2852_p2 }
  0x59   : > { %p2848_p13 = pneg %p2847_p4 }
  0x5b   : > { %p2855_p8 = pnand %p2854_p6, %p2848_p13 }
  0x5d   : > { %2858 = shalt.err (!%p2855_p8)
}
  0x5e   : > { %s3011_s7 = smov 128   ;;  %s3012_s11 = smov 8  }
  0x5f   : > { %2647 = dma.hbm_to_vmem [thread:$0]  (!%p3236_p5), %s3725_s0, 256, %s3224_s15, [#allocation3], %s3011_s7, %s3011_s7, %s3012_s11  }
  0x60   : > { %s2859_s14 = scalar_lea.hbm %s3232_s24, 16  ;;  %p3726_p9 = scmp.ne.s32.totalorder %s3720_s16, 0 }
  0x61   : > { %p2860_p7 = scmp.ne.s32.totalorder %s3232_s24, %s2859_s14  ;;  %s2864_s13 = scalar_lea.hbm %s3723_s9, 32 }
  0x62   : > { %p2865_p8 = scmp.lt.u32.totalorder %s3232_s24, %s3723_s9  ;;  %p2866_p13 = scmp.lt.u32.totalorder %s2864_s13, %s2859_s14 }
  0x63   : > { %p2862_p2 = pnand %p2860_p7, %p3726_p9  ;;  %p2868_p11 = scmp.lt.u32.totalorder %s2859_s14, %s3232_s24 }
  0x64   : > { %p2867_p3 = por %p2866_p13, %p2865_p8 }
  0x65   : > { %p2863_p6 = pneg %p2862_p2 }
  0x66   : > { %p2869_p12 = por %p2868_p11, %p2867_p3 }
  0x68   : > { %p2870_p10 = pnand %p2869_p12, %p2863_p6 }
  0x6a   : > { %2873 = shalt.err (!%p2870_p10)
}
  0x6b   : > { %s2874_s15 = scalar_lea.vmem %s3241_s8, 16  ;;  %s3013_s17 = smov [#allocation7]  }
  0x6c   : > { %p2875_p5 = scmp.ne.s32.totalorder %s3241_s8, %s2874_s15  ;;  %s2879_s7 = sshll.u32 %s3013_s17, 4  ;;  %s2880_s7 = int_to_ptr.vmem [resolvable:$false] %s2879_s7 }
  0x6d   : > { %s2881_s5 = scalar_lea.vmem %s2880_s7, 32  ;;  %p2882_p4 = scmp.lt.s32.totalorder %s3241_s8, %s2880_s7 }
  0x6e   : > { %p2877_p0 = pnand %p2875_p5, %p3726_p9  ;;  %p2883_p7 = scmp.lt.s32.totalorder %s2881_s5, %s2874_s15 }
  0x70   : > { %p2878_p1 = pneg %p2877_p0  ;;  %p2884_p2 = por %p2883_p7, %p2882_p4 }
  0x72   : > { %p2885_p8 = pnand %p2884_p2, %p2878_p1 }
  0x74   : > { %2888 = shalt.err (!%p2885_p8)
}
  0x75   : > { %p3727_p6 = scmp.ne.s32.totalorder %s3719_s26, 0  ;;  %s3728_s10 = sld [smem:[#allocation28_spill]] }
  0x76   : > { %s580_s23 = scalar_lea.vmem [#allocation8], %s3155_s28  ;;  %s578_s18 = scalar_lea.sflag [#allocation9], %s3155_s28 }
  0x77   : > { %2654 = dma.hbm_to_vmem [thread:$0]  (!%p3727_p6), %s3232_s24, 16, %s3241_s8, %s3176_s25  }
  0x78   : > { %s587_s14 = sshll.u32 %s580_s23, 4  ;;  %s588_s14 = int_to_ptr.vmem [resolvable:$true] %s587_s14 }
  0x7b   : > { %s3290_s12 = scalar_lea.hbm %s3728_s10, %s3158_s29  ;;  %s2894_s25 = scalar_lea.hbm %s3728_s10, 32 }
  0x7c   : > { %s2889_s27 = scalar_lea.hbm %s3290_s12, 16  ;;  %p2895_p12 = scmp.lt.u32.totalorder %s3290_s12, %s3728_s10 }
  0x7d   : > { %p2890_p13 = scmp.ne.s32.totalorder %s3290_s12, %s2889_s27  ;;  %p2896_p10 = scmp.lt.u32.totalorder %s2894_s25, %s2889_s27 }
  0x7e   : > { %p2898_p0 = scmp.lt.u32.totalorder %s2889_s27, %s3290_s12 }
  0x7f   : > { %p2892_p3 = pnand %p2890_p13, %p3726_p9  ;;  %p2897_p5 = por %p2896_p10, %p2895_p12 }
  0x81   : > { %p2893_p11 = pneg %p2892_p3  ;;  %p2899_p1 = por %p2898_p0, %p2897_p5 }
  0x83   : > { %p2900_p4 = pnand %p2899_p1, %p2893_p11 }
  0x85   : > { %2903 = shalt.err (!%p2900_p4)
}
  0x86   : > { %s2904_s28 = scalar_lea.vmem %s588_s14, 16  ;;  %s3014_s15 = smov [#allocation8]  }
  0x87   : > { %p2905_p7 = scmp.ne.s32.totalorder %s588_s14, %s2904_s28  ;;  %s2909_s17 = sshll.u32 %s3014_s15, 4  ;;  %s2910_s17 = int_to_ptr.vmem [resolvable:$false] %s2909_s17 }
  0x88   : > { %s2911_s7 = scalar_lea.vmem %s2910_s17, 32  ;;  %p2912_p13 = scmp.lt.s32.totalorder %s588_s14, %s2910_s17 }
  0x89   : > { %p2907_p2 = pnand %p2905_p7, %p3726_p9  ;;  %p2913_p3 = scmp.lt.s32.totalorder %s2911_s7, %s2904_s28 }
  0x8b   : > { %p2908_p8 = pneg %p2907_p2  ;;  %p2914_p6 = por %p2913_p3, %p2912_p13 }
  0x8d   : > { %p2915_p10 = pnand %p2914_p6, %p2908_p8 }
  0x8f   : > { %2918 = shalt.err (!%p2915_p10)
}
  0x90   : > { %p3729_p12 = scmp.ne.s32.totalorder %s3719_s26, 0  ;;  %p3730_p11 = scmp.ne.s32.totalorder %s3722_s30, 0 }
  0x91   : > { %p3731_p5 = scmp.eq.s32.totalorder (!%p3730_p11), %s3207_s20, 0 }
  0x92   : > { %2657 = dma.hbm_to_vmem [thread:$0]  (!%p3729_p12), %s3290_s12, 16, %s588_s14, %s578_s18  }
  0x93   : > { %622 = sbr.rel (%p3730_p11) target bundleno = 4621 (0x120d), region = 80 }
  0x9a   : > { %2970 = dma.done.wait (%p3731_p5), [#allocation3], 256   ;;  %p3732_p9 = pmov %p3731_p5 }
  0x9b   : > { %s628_s16 = sand.u32 1, %s3207_s20   ;;  %s3319_s5 = sand.u32 1, %s2991_s19  }
  0x9c   : > { %2972 = vsyncadd (%p3732_p9), [#allocation3], 4294967040  ;;  %s629_s6 = scalar_lea.sflag [#allocation6], %s628_s16  ;;  %p3733_p6 = scmp.ne.s32.totalorder %s3721_s22, 0 }
  0x9e   : > { %2974 = dma.done.wait (%p3733_p6), %s629_s6, 32  }
  0x9f   : > { %2976 = vsyncadd (%p3733_p6), %s629_s6, 4294967264  ;;  %s645_s11 = scalar_lea.sflag [#allocation9], %s3319_s5 }
  0xa0   : > { %2978 = dma.done.wait (%p3733_p6), %s645_s11, 16  }
  0xa1   : > { %2980 = vsyncadd (%p3733_p6), %s645_s11, 4294967280  ;;  %p738_p0 = scmp.lt.s32.totalorder %s2999_s21, 1  ;;  %s3734_s1 = sld [smem:[#allocation21_spill]] }
  0xa2   : > { %s3735_s3 = sld [smem:[#allocation22_spill]]  ;;  %s3736_s11 = sld [smem:[#allocation23_spill]] }
  0xa3   : > { %s3335_s23 = scalar_select %p738_p0, %s2999_s21, 1 }
  0xa4   : > { %s3738_s8 = sld [smem:[#allocation25_spill]]  ;;  %s3740_s7 = sld [smem:[#allocation29_spill]] }
  0xa5   : > { %s2445_s14 = sshll.u32 %s3335_s23, 4  ;;  %s2448_s24 = sshll.u32 %s3335_s23, 5 }
  0xa6   : > { %s3742_s26 = sld [smem:[#allocation32_spill]]  ;;  %p2397_p1 = scmp.ne.s32.totalorder %s2999_s21, 0 }
  0xa7   : > { %s742_s25 = scalar_lea.vmem %s3734_s1, %s2445_s14  ;;  %v785_v0 = vld [vmem:[#allocation2] sm:$0xff] (!%p2397_p1)  ;;  %vm787_vm0 = vcmask (!%p2397_p1), 261120   ;;  %v786_v1 = vld [vmem:[#allocation2 + $0x8] sm:$0xff] (!%p2397_p1) }
  0xa8   : > { %s3348_s28 = scalar_lea.vmem %s3735_s3, %s2445_s14  ;;  %s756_s12 = scalar_lea.vmem %s3736_s11, %s3335_s23  ;;  %788 = vst.msk [vmem:[#allocation10] sm:$0xff] (!%p2397_p1), %vm787_vm0, %v785_v0  ;;  %789 = vst.msk [vmem:[#allocation10 + $0x8] sm:$0xff] (!%p2397_p1), %vm787_vm0, %v786_v1 }
  0xa9   : > { %s3739_s3 = sld [smem:[#allocation30_spill]]  ;;  %s3741_s11 = sld [smem:[#allocation31_spill]] }
  0xaa   : > { %s3365_s0 = scalar_lea.vmem %s3738_s8, %s2445_s14  ;;  %s3375_s10 = scalar_lea.vmem %s3740_s7, %s2448_s24 }
  0xab   : > { %784 = sbr.rel (%p2397_p1) target bundleno = 178 (0xb2), region = 100 }
  0xac   : > { %s778_s22 = scalar_lea.vmem %s3742_s26, %s3335_s23 }
  0xaf   : > { %s772_s9 = scalar_lea.vmem %s3739_s3, %s3335_s23  ;;  %s775_s30 = scalar_lea.vmem %s3741_s11, %s3335_s23 }
  0xb2 PF: > { %v2747_v2 = vld [vmem:[%s742_s25] sm:$0xff]   ;;  %v3015_v3 = vmov 0.0   ;;  %v2748_v4 = vld [vmem:[%s742_s25 + $0x8] sm:$0xff]   ;;  %vm3016_vm1 = vmmov 0   ;;  %v3390_v5 = vld [vmem:[#allocation10] sm:$0xff]  ;;  %vm816_vm2 = vcmask 261120   ;;  %s3743_s21 = scalar_lea.vmem %s3673_s2, %s3335_s23  ;;  %s3744_s1 = scalar_lea.vmem %s3675_s4, %s3335_s23 }
  0xb3   : > { %2498 = vmatprep.subr.bf16.mxu0 %v3015_v3  ;;  %2506 = vmatprep.subr.bf16.mxu1 %v3015_v3  ;;  %v3392_v6 = vld [vmem:[#allocation10 + $0x8] sm:$0xff]  ;;  %s3017_s26 = smov 96   ;;  %vm869_vm3 = vcmask 64512   ;;  %s3018_s14 = smov 64   ;;  %vm993_vm4 = vcmask 1043456   ;;  %vm1771_vm5 = vcmask 130048  }
  0xb4   : > { %2499 = vmatpush3.bf16.msra.mxu0 %v2747_v2  ;;  %2502 = vmatprep.mubr.msk.bf16.mxu0 %vm3016_vm1, %v3015_v3  ;;  %v792_v7 = vpack.c.bf16 %v3392_v6, %v3390_v5  ;;  %v2398_v8 = vld [vmem:[%s3743_s21] ss:$0 sm:$0xff]  ;;  %s3019_s25 = smov 88   ;;  %s3020_s7 = smov 120   ;;  %vm1774_vm6 = vcmask 195584   ;;  %vm1970_vm7 = vcmask 523264  }
  0xb5   : > { %2500 = vmatprep.subr.bf16.mxu0 %v3015_v3  ;;  %2508 = vmatprep.mubr.msk.bf16.mxu1 %vm3016_vm1, %v3015_v3  ;;  %s3021_s13 = smov 56   ;;  %s3022_s8 = smov 80  }
  0xb6   : > { %s3023_s24 = smov 112   ;;  %s3024_s29 = smov 48  }
  0xb7   : > { %s3025_s15 = smov 72   ;;  %s3026_s17 = smov 104  }
  0xb8   : > { %2501 = vmatpush3.bf16.msra.mxu0 %v2748_v4  ;;  %s3027_s16 = smov 40   ;;  %s3028_s6 = smov 8  }
  0xb9   : > { %2512 = vmatprep.subr.bf16.mxu0 %v3015_v3  ;;  %s3029_s11 = smov 16   ;;  %s3030_s18 = smov 24  }
  0xba   : > { %p2661_p4 = scmp.eq.s32.totalorder %s3207_s20, 1 }
  0xbb   : > { %2503 = vmatmul.mubr.msk.bf16.vlgmr.msra.gmra.mrb[0].mxu0 %vm816_vm2, %v792_v7 }
  0xbc   : > { %2514 = vmatprep.mubr.msk.bf16.mxu0 %vm3016_vm1, %v3015_v3 }
 0x18e   : > { %v854_v9 = vpop.f32.mrb[0].mxu0 }
 0x18f   : > { %v855_v10 = vadd.f32 %v2398_v8, %v854_v9  ;;  %v2504_v11 = vpop.f32.mrb[1].mxu0 }
 0x190   : > { %v857_v12 = vpop.f32.mrb[2].mxu0 }
 0x191   : > { %v3408_v13 = vpack.c.bf16 %v855_v10, %v855_v10  ;;  %v858_v14 = vadd.f32 %v2398_v8, %v857_v12  ;;  %v2505_v15 = vpop.f32.mrb[3].mxu0 }
 0x193   : > { %867 = vrot.lane.b32.xlu0 %v3408_v13, %s3017_s26  ;;  %v3411_v16 = vpack.c.bf16 %v858_v14, %v858_v14 }
 0x197   : > { %916 = vrot.lane.b32.xlu0 %v3411_v16, %s3017_s26 }
 0x205   : > { %v868_v17 = vpop.permute.xlu0 %867 }
 0x206   : > { %v874_v18 = vsel %vm869_vm3, %v868_v17, 0 }
 0x207   : > { %2507 = vmatpush3.bf16.xpose.msra.mxu1 %v874_v18 }
 0x208   : > { %2518 = vmatprep.subr.bf16.mxu1 %v3015_v3 }
 0x209   : > { %v917_v19 = vpop.permute.xlu0 %916 }
 0x20a   : > { %v922_v20 = vsel %vm869_vm3, %v917_v19, 0 }
 0x20b   : > { %2513 = vmatpush3.bf16.xpose.msra.mxu0 %v922_v20 }
 0x20c   : > { %2524 = vmatprep.subr.bf16.mxu0 %v3015_v3 }
 0x20e   : > { %2509 = vmatmul.mubr.msk.bf16.vlgmr.msra.gmra.mrb[0].mxu1 %vm869_vm3, %v3408_v13 }
 0x20f   : > { %2520 = vmatprep.mubr.msk.bf16.mxu1 %vm3016_vm1, %v3015_v3 }
 0x212   : > { %2515 = vmatmul.mubr.msk.bf16.vlgmr.msra.gmra.mrb[4].mxu0 %vm869_vm3, %v3411_v16 }
 0x213   : > { %2526 = vmatprep.mubr.msk.bf16.mxu0 %vm3016_vm1, %v3015_v3 }
 0x2e1   : > { %v910_v21 = vpop.f32.mrb[0].mxu1 }
 0x2e2   : > { %v2510_v22 = vpop.f32.mrb[1].mxu1  ;;  %v964_v23 = vsel %vm869_vm3, %v910_v21, -inf }
 0x2e3   : > { %965 = vmax.xlane.f32.xlu1 %v964_v23  ;;  %v913_v24 = vpop.f32.mrb[2].mxu1 }
 0x2e4   : > { %v2511_v25 = vpop.f32.mrb[3].mxu1 }
 0x2e5   : > { %v958_v26 = vpop.f32.mrb[4].mxu0 }
 0x2e6   : > { %v2516_v27 = vpop.f32.mrb[5].mxu0  ;;  %v967_v28 = vsel %vm869_vm3, %v958_v26, -inf }
 0x2e7   : > { %968 = vmax.xlane.f32.xlu1 %v967_v28  ;;  %v961_v29 = vpop.f32.mrb[6].mxu0 }
 0x2e8   : > { %v2517_v30 = vpop.f32.mrb[7].mxu0 }
 0x2f8   : > { %988 = vrot.lane.b32.xlu1 %v3408_v13, %s3018_s14 }
 0x2fc   : > { %1037 = vrot.lane.b32.xlu1 %v3411_v16, %s3018_s14 }
 0x300   : > { %1087 = vrot.lane.b32.xlu1 %v3408_v13, %s3019_s25 }
 0x370   : > { %v966_v31 = vpop.xlane.xlu1 %965 }
 0x371   : > { %v970_v32 = vsub.f32 %v910_v21, %v966_v31 }
 0x373   : > { %v972_v33 = vmul.f32 1.442695, %v970_v32 }
 0x374   : > { %v969_v34 = vpop.xlane.xlu1 %968 }
 0x375   : > { %2757 = vpow2.f32 %v972_v33  ;;  %v971_v35 = vsub.f32 %v958_v26, %v969_v34 }
 0x377   : > { %v974_v36 = vmul.f32 1.442695, %v971_v35 }
 0x378   : > { %v989_v37 = vpop.permute.xlu1 %988 }
 0x379   : > { %2759 = vpow2.f32 %v974_v36  ;;  %v995_v38 = vsel %vm993_vm4, %v989_v37, 0 }
 0x37a   : > { %2519 = vmatpush3.bf16.msra.mxu1 %v995_v38 }
 0x37b   : > { %2530 = vmatprep.subr.bf16.mxu1 %v3015_v3 }
 0x37c   : > { %v1038_v39 = vpop.permute.xlu1 %1037 }
 0x37d   : > { %v1043_v40 = vsel %vm993_vm4, %v1038_v39, 0 }
 0x37e   : > { %2525 = vmatpush3.bf16.msra.mxu0 %v1043_v40 }
 0x37f   : > { %v2758_v41 = vpop.eup %2757  ;;  %2536 = vmatprep.subr.bf16.mxu0 %v3015_v3 }
 0x380   : > { %v976_v42 = vsel %vm869_vm3, %v2758_v41, 0.0  ;;  %v1088_v45 = vpop.permute.xlu1 %1087 }
 0x381   : > { %977 = vadd.xlane.f32.xlu0 %v976_v42  ;;  %v1093_v52 = vsel %vm869_vm3, %v1088_v45, 0 }
 0x383   : > { %v2760_v43 = vpop.eup %2759 }
 0x384   : > { %v979_v44 = vsel %vm869_vm3, %v2760_v43, 0.0 }
 0x385   : > { %980 = vadd.xlane.f32.xlu1 %v979_v44 }
 0x396   : > { %1137 = vrot.lane.b32.xlu1 %v3411_v16, %s3019_s25  ;;  %s3746_s25 = sld [smem:[#allocation24_spill]] }
 0x397   : > { %1085 = vrot.lane.b32.xlu0 %v3408_v13, %s3020_s7 }
 0x39a   : > { %1135 = vrot.lane.b32.xlu1 %v3411_v16, %s3020_s7 }
 0x39c   : > { %s3747_s7 = scalar_lea.vmem %s3746_s25, %s3335_s23 }
 0x40e   : > { %v978_v46 = vpop.xlane.xlu0 %977 }
 0x40f   : > { %2761 = vrcp.f32 %v978_v46 }
 0x412   : > { %v981_v47 = vpop.xlane.xlu1 %980  ;;  %v1086_v57 = vpop.permute.xlu0 %1085 }
 0x413   : > { %2763 = vrcp.f32 %v981_v47 }
 0x416   : > { %v1138_v54 = vpop.permute.xlu1 %1137 }
 0x417   : > { %v1143_v56 = vsel %vm869_vm3, %v1138_v54, 0 }
 0x419   : > { %v2762_v48 = vpop.eup %2761 }
 0x41a   : > { %v984_v49 = vmul.f32 %v2762_v48, %v2758_v41  ;;  %v1136_v58 = vpop.permute.xlu1 %1135 }
 0x41c   : > { %v986_v50 = vpack.c.bf16 %v984_v49, %v984_v49 }
 0x41d   : > { %v2764_v51 = vpop.eup %2763 }
 0x41e   : > { %v985_v53 = vmul.f32 %v2764_v51, %v2760_v43  ;;  %2521 = vmatmul.mubr.msk.bf16.vlgmr.msra.gmra.mrb[4].mxu1 %vm869_vm3, %v986_v50 }
 0x41f   : > { %2531 = vmatpush3.bf16.xpose.msra.mxu1 %v1093_v52  ;;  %2532 = vmatprep.mubr.msk.bf16.mxu1 %vm3016_vm1, %v3015_v3 }
 0x420   : > { %v987_v55 = vpack.c.bf16 %v985_v53, %v985_v53  ;;  %2542 = vmatprep.subr.bf16.mxu1 %v3015_v3 }
 0x422   : > { %2527 = vmatmul.mubr.msk.bf16.vlgmr.msra.gmra.mrb[8].mxu0 %vm869_vm3, %v987_v55 }
 0x423   : > { %2537 = vmatpush3.bf16.xpose.msra.mxu0 %v1143_v56  ;;  %2538 = vmatprep.mubr.msk.bf16.mxu0 %vm3016_vm1, %v3015_v3 }
 0x424   : > { %2548 = vmatprep.subr.bf16.mxu0 %v3015_v3 }
 0x426   : > { %2533 = vmatmul.mubr.msk.bf16.vlgmr.msra.gmra.mrb[8].mxu1 %vm869_vm3, %v1086_v57 }
 0x427   : > { %2544 = vmatprep.mubr.msk.bf16.mxu1 %vm3016_vm1, %v3015_v3 }
 0x42a   : > { %2539 = vmatmul.mubr.msk.bf16.vlgmr.msra.gmra.mrb[12].mxu0 %vm869_vm3, %v1136_v58 }
 0x42b   : > { %2550 = vmatprep.mubr.msk.bf16.mxu0 %vm3016_vm1, %v3015_v3 }
 0x4f1   : > { %v3456_v59 = vpop.f32.mrb[4].mxu1 }
 0x4f2   : > { %v2522_v60 = vpop.f32.mrb[5].mxu1 }
 0x4f3   : > { %v1034_v61 = vpop.f32.mrb[6].mxu1 }
 0x4f4   : > { %v2523_v62 = vpop.f32.mrb[7].mxu1 }
 0x4f5   : > { %v3458_v63 = vpop.f32.mrb[8].mxu0 }
 0x4f6   : > { %v2528_v0 = vpop.f32.mrb[9].mxu0 }
 0x4f7   : > { %v1082_v1 = vpop.f32.mrb[10].mxu0 }
 0x4f8   : > { %v2529_v2 = vpop.f32.mrb[11].mxu0 }
 0x4f9   : > { %v1129_v4 = vpop.f32.mrb[8].mxu1 }
 0x4fa   : > { %v2534_v7 = vpop.f32.mrb[9].mxu1  ;;  %v1185_v8 = vsel %vm869_vm3, %v1129_v4, -inf }
 0x4fb   : > { %1186 = vmax.xlane.f32.xlu1 %v1185_v8  ;;  %v1132_v9 = vpop.f32.mrb[10].mxu1 }
 0x4fc   : > { %v2535_v10 = vpop.f32.mrb[11].mxu1 }
 0x4fd   : > { %v1179_v11 = vpop.f32.mrb[12].mxu0 }
 0x4fe   : > { %v2540_v12 = vpop.f32.mrb[13].mxu0  ;;  %v1188_v14 = vsel %vm869_vm3, %v1179_v11, -inf }
 0x4ff   : > { %1189 = vmax.xlane.f32.xlu0 %v1188_v14  ;;  %v1182_v15 = vpop.f32.mrb[14].mxu0 }
 0x500   : > { %v2541_v17 = vpop.f32.mrb[15].mxu0 }
 0x50c   : > { %1209 = vrot.lane.b32.xlu1 %v3408_v13, %s3021_s13 }
 0x510   : > { %1307 = vrot.lane.b32.xlu1 %v3408_v13, %s3022_s8 }
 0x515   : > { %1257 = vrot.lane.b32.xlu0 %v3411_v16, %s3021_s13  ;;  %s3749_s13 = scalar_lea.vmem [#allocation7], %s3319_s5 }
 0x519   : > { %1305 = vrot.lane.b32.xlu0 %v3408_v13, %s3023_s24 }
 0x588   : > { %v1187_v18 = vpop.xlane.xlu1 %1186 }
 0x589   : > { %v1191_v19 = vsub.f32 %v1129_v4, %v1187_v18 }
 0x58b   : > { %v1193_v20 = vmul.f32 1.442695, %v1191_v19 }
 0x58c   : > { %v1210_v21 = vpop.permute.xlu1 %1209  ;;  %v1190_v22 = vpop.xlane.xlu0 %1189 }
 0x58d   : > { %2765 = vpow2.f32 %v1193_v20  ;;  %v1215_v23 = vsel %vm993_vm4, %v1210_v21, 0  ;;  %v1192_v24 = vsub.f32 %v1179_v11, %v1190_v22 }
 0x58e   : > { %2543 = vmatpush3.bf16.msra.mxu1 %v1215_v23 }
 0x58f   : > { %v1195_v25 = vmul.f32 1.442695, %v1192_v24  ;;  %2554 = vmatprep.subr.bf16.mxu1 %v3015_v3 }
 0x590   : > { %v1258_v26 = vpop.permute.xlu0 %1257  ;;  %v1308_v32 = vpop.permute.xlu1 %1307 }
 0x591   : > { %2767 = vpow2.f32 %v1195_v25  ;;  %v1263_v27 = vsel %vm993_vm4, %v1258_v26, 0  ;;  %v1313_v39 = vsel %vm869_vm3, %v1308_v32, 0 }
 0x592   : > { %2549 = vmatpush3.bf16.msra.mxu0 %v1263_v27 }
 0x593   : > { %2560 = vmatprep.subr.bf16.mxu0 %v3015_v3 }
 0x594   : > { %v1306_v44 = vpop.permute.xlu0 %1305 }
 0x597   : > { %v2766_v28 = vpop.eup %2765 }
 0x598   : > { %v1197_v29 = vsel %vm869_vm3, %v2766_v28, 0.0 }
 0x599   : > { %1198 = vadd.xlane.f32.xlu1 %v1197_v29 }
 0x59b   : > { %v2768_v30 = vpop.eup %2767 }
 0x59c   : > { %v1200_v31 = vsel %vm869_vm3, %v2768_v30, 0.0 }
 0x59d   : > { %1201 = vadd.xlane.f32.xlu1 %v1200_v31 }
 0x5ae   : > { %1357 = vrot.lane.b32.xlu1 %v3411_v16, %s3022_s8 }
 0x5b2   : > { %1355 = vrot.lane.b32.xlu1 %v3411_v16, %s3023_s24 }
 0x626   : > { %v1199_v33 = vpop.xlane.xlu1 %1198 }
 0x627   : > { %2769 = vrcp.f32 %v1199_v33 }
 0x62a   : > { %v1202_v34 = vpop.xlane.xlu1 %1201 }
 0x62b   : > { %2771 = vrcp.f32 %v1202_v34 }
 0x62e   : > { %v1358_v41 = vpop.permute.xlu1 %1357 }
 0x62f   : > { %v1363_v43 = vsel %vm869_vm3, %v1358_v41, 0 }
 0x631   : > { %v2770_v35 = vpop.eup %2769 }
 0x632   : > { %v1205_v36 = vmul.f32 %v2770_v35, %v2766_v28  ;;  %v1356_v45 = vpop.permute.xlu1 %1355 }
 0x634   : > { %v1207_v37 = vpack.c.bf16 %v1205_v36, %v1205_v36 }
 0x635   : > { %v2772_v38 = vpop.eup %2771 }
 0x636   : > { %v1206_v40 = vmul.f32 %v2772_v38, %v2768_v30  ;;  %2545 = vmatmul.mubr.msk.bf16.vlgmr.msra.gmra.mrb[12].mxu1 %vm869_vm3, %v1207_v37 }
 0x637   : > { %2555 = vmatpush3.bf16.xpose.msra.mxu1 %v1313_v39  ;;  %2556 = vmatprep.mubr.msk.bf16.mxu1 %vm3016_vm1, %v3015_v3 }
 0x638   : > { %v1208_v42 = vpack.c.bf16 %v1206_v40, %v1206_v40  ;;  %2566 = vmatprep.subr.bf16.mxu1 %v3015_v3 }
 0x63a   : > { %2551 = vmatmul.mubr.msk.bf16.vlgmr.msra.gmra.mrb[16].mxu0 %vm869_vm3, %v1208_v42 }
 0x63b   : > { %2561 = vmatpush3.bf16.xpose.msra.mxu0 %v1363_v43  ;;  %2562 = vmatprep.mubr.msk.bf16.mxu0 %vm3016_vm1, %v3015_v3 }
 0x63c   : > { %2572 = vmatprep.subr.bf16.mxu0 %v3015_v3 }
 0x63e   : > { %2557 = vmatmul.mubr.msk.bf16.vlgmr.msra.gmra.mrb[16].mxu1 %vm869_vm3, %v1306_v44 }
 0x63f   : > { %2568 = vmatprep.mubr.msk.bf16.mxu1 %vm3016_vm1, %v3015_v3 }
 0x642   : > { %2563 = vmatmul.mubr.msk.bf16.vlgmr.msra.gmra.mrb[20].mxu0 %vm869_vm3, %v1356_v45 }
 0x643   : > { %2574 = vmatprep.mubr.msk.bf16.mxu0 %vm3016_vm1, %v3015_v3 }
 0x709   : > { %v3490_v46 = vpop.f32.mrb[12].mxu1 }
 0x70a   : > { %v2546_v47 = vpop.f32.mrb[13].mxu1 }
 0x70b   : > { %v1254_v48 = vpop.f32.mrb[14].mxu1 }
 0x70c   : > { %v2547_v49 = vpop.f32.mrb[15].mxu1 }
 0x70d   : > { %v3492_v50 = vpop.f32.mrb[16].mxu0 }
 0x70e   : > { %v2732_v51 = vpack.i.bf16 %v3492_v50, %v3490_v46  ;;  %v2552_v52 = vpop.f32.mrb[17].mxu0 }
 0x70f   : > { %v1302_v53 = vpop.f32.mrb[18].mxu0 }
 0x710   : > { %v2553_v54 = vpop.f32.mrb[19].mxu0 }
 0x711   : > { %v1349_v55 = vpop.f32.mrb[16].mxu1 }
 0x712   : > { %v2558_v56 = vpop.f32.mrb[17].mxu1  ;;  %v1405_v57 = vsel %vm869_vm3, %v1349_v55, -inf }
 0x713   : > { %1406 = vmax.xlane.f32.xlu0 %v1405_v57  ;;  %v1352_v58 = vpop.f32.mrb[18].mxu1 }
 0x714   : > { %v2559_v60 = vpop.f32.mrb[19].mxu1 }
 0x715   : > { %v1399_v61 = vpop.f32.mrb[20].mxu0 }
 0x716   : > { %v2564_v62 = vpop.f32.mrb[21].mxu0  ;;  %v1408_v0 = vsel %vm869_vm3, %v1399_v61, -inf }
 0x717   : > { %1409 = vmax.xlane.f32.xlu1 %v1408_v0  ;;  %v1402_v1 = vpop.f32.mrb[22].mxu0 }
 0x718   : > { %v2565_v2 = vpop.f32.mrb[23].mxu0 }
 0x728   : > { %1429 = vrot.lane.b32.xlu1 %v3408_v13, %s3024_s29 }
 0x72c   : > { %1527 = vrot.lane.b32.xlu1 %v3408_v13, %s3025_s15 }
 0x730   : > { %1577 = vrot.lane.b32.xlu1 %v3411_v16, %s3025_s15 }
 0x734   : > { %1575 = vrot.lane.b32.xlu1 %v3411_v16, %s3026_s17 }
 0x7a0   : > { %v1407_v4 = vpop.xlane.xlu0 %1406 }
 0x7a1   : > { %v1411_v7 = vsub.f32 %v1349_v55, %v1407_v4 }
 0x7a3   : > { %v1413_v8 = vmul.f32 1.442695, %v1411_v7 }
 0x7a4   : > { %v1410_v9 = vpop.xlane.xlu1 %1409 }
 0x7a5   : > { %2773 = vpow2.f32 %v1413_v8  ;;  %v1412_v10 = vsub.f32 %v1399_v61, %v1410_v9 }
 0x7a7   : > { %v1415_v11 = vmul.f32 1.442695, %v1412_v10 }
 0x7a8   : > { %v1430_v12 = vpop.permute.xlu1 %1429 }
 0x7a9   : > { %2775 = vpow2.f32 %v1415_v11  ;;  %v1435_v14 = vsel %vm993_vm4, %v1430_v12, 0 }
 0x7aa   : > { %2567 = vmatpush3.bf16.msra.mxu1 %v1435_v14 }
 0x7ab   : > { %2578 = vmatprep.subr.bf16.mxu1 %v3015_v3 }
 0x7ac   : > { %v1528_v25 = vpop.permute.xlu1 %1527 }
 0x7ad   : > { %v1533_v29 = vsel %vm869_vm3, %v1528_v25, 0 }
 0x7af   : > { %v2774_v15 = vpop.eup %2773 }
 0x7b0   : > { %v1417_v17 = vsel %vm869_vm3, %v2774_v15, 0.0  ;;  %v1578_v31 = vpop.permute.xlu1 %1577 }
 0x7b1   : > { %1418 = vadd.xlane.f32.xlu0 %v1417_v17  ;;  %v1583_v33 = vsel %vm869_vm3, %v1578_v31, 0 }
 0x7b3   : > { %v2776_v18 = vpop.eup %2775 }
 0x7b4   : > { %v1420_v19 = vsel %vm869_vm3, %v2776_v18, 0.0  ;;  %v1576_v35 = vpop.permute.xlu1 %1575 }
 0x7b5   : > { %1421 = vadd.xlane.f32.xlu0 %v1420_v19  ;;  %v2750_v19 = vld [vmem:[%s3348_s28 + $0x8] sm:$0xff]  }
 0x7cb   : > { %1477 = vrot.lane.b32.xlu0 %v3411_v16, %s3024_s29 }
 0x7cf   : > { %1525 = vrot.lane.b32.xlu0 %v3408_v13, %s3026_s17 }
 0x83e   : > { %v1419_v20 = vpop.xlane.xlu0 %1418 }
 0x83f   : > { %2777 = vrcp.f32 %v1419_v20 }
 0x842   : > { %v1422_v21 = vpop.xlane.xlu0 %1421 }
 0x843   : > { %2779 = vrcp.f32 %v1422_v21 }
 0x846   : > { %v1478_v22 = vpop.permute.xlu0 %1477 }
 0x847   : > { %v1483_v23 = vsel %vm993_vm4, %v1478_v22, 0 }
 0x848   : > { %2573 = vmatpush3.bf16.msra.mxu0 %v1483_v23 }
 0x849   : > { %v2778_v24 = vpop.eup %2777  ;;  %2584 = vmatprep.subr.bf16.mxu0 %v3015_v3 }
 0x84a   : > { %v1425_v26 = vmul.f32 %v2778_v24, %v2774_v15  ;;  %v1526_v34 = vpop.permute.xlu0 %1525 }
 0x84c   : > { %v1427_v27 = vpack.c.bf16 %v1425_v26, %v1425_v26 }
 0x84d   : > { %v2780_v28 = vpop.eup %2779 }
 0x84e   : > { %v1426_v30 = vmul.f32 %v2780_v28, %v2776_v18  ;;  %2569 = vmatmul.mubr.msk.bf16.vlgmr.msra.gmra.mrb[20].mxu1 %vm869_vm3, %v1427_v27  ;;  %v2749_v18 = vld [vmem:[%s3348_s28] sm:$0xff]  }
 0x84f   : > { %2579 = vmatpush3.bf16.xpose.msra.mxu1 %v1533_v29  ;;  %2580 = vmatprep.mubr.msk.bf16.mxu1 %vm3016_vm1, %v3015_v3 }
 0x850   : > { %v1428_v32 = vpack.c.bf16 %v1426_v30, %v1426_v30  ;;  %2590 = vmatprep.subr.bf16.mxu1 %v3015_v3 }
 0x852   : > { %2575 = vmatmul.mubr.msk.bf16.vlgmr.msra.gmra.mrb[24].mxu0 %vm869_vm3, %v1428_v32 }
 0x853   : > { %2585 = vmatpush3.bf16.xpose.msra.mxu0 %v1583_v33  ;;  %2586 = vmatprep.mubr.msk.bf16.mxu0 %vm3016_vm1, %v3015_v3 }
 0x854   : > { %2596 = vmatprep.subr.bf16.mxu0 %v3015_v3 }
 0x856   : > { %2581 = vmatmul.mubr.msk.bf16.vlgmr.msra.gmra.mrb[24].mxu1 %vm869_vm3, %v1526_v34 }
 0x857   : > { %2592 = vmatprep.mubr.msk.bf16.mxu1 %vm3016_vm1, %v3015_v3 }
 0x85a   : > { %2587 = vmatmul.mubr.msk.bf16.vlgmr.msra.gmra.mrb[28].mxu0 %vm869_vm3, %v1576_v35 }
 0x85b   : > { %2598 = vmatprep.mubr.msk.bf16.mxu0 %vm3016_vm1, %v3015_v3 }
 0x921   : > { %v1471_v36 = vpop.f32.mrb[20].mxu1 }
 0x922   : > { %v2570_v37 = vpop.f32.mrb[21].mxu1 }
 0x923   : > { %v1474_v38 = vpop.f32.mrb[22].mxu1 }
 0x924   : > { %v2571_v39 = vpop.f32.mrb[23].mxu1 }
 0x925   : > { %v1519_v40 = vpop.f32.mrb[24].mxu0 }
 0x926   : > { %v2737_v41 = vpack.i.bf16 %v1519_v40, %v1471_v36  ;;  %v2576_v42 = vpop.f32.mrb[25].mxu0 }
 0x927   : > { %v1522_v43 = vpop.f32.mrb[26].mxu0 }
 0x928   : > { %v2577_v44 = vpop.f32.mrb[27].mxu0 }
 0x929   : > { %v1569_v45 = vpop.f32.mrb[24].mxu1 }
 0x92a   : > { %v2582_v47 = vpop.f32.mrb[25].mxu1  ;;  %v1625_v48 = vsel %vm869_vm3, %v1569_v45, -inf }
 0x92b   : > { %1626 = vmax.xlane.f32.xlu0 %v1625_v48  ;;  %v1572_v49 = vpop.f32.mrb[26].mxu1 }
 0x92c   : > { %v2583_v52 = vpop.f32.mrb[27].mxu1 }
 0x92d   : > { %v1619_v53 = vpop.f32.mrb[28].mxu0 }
 0x92e   : > { %v2588_v54 = vpop.f32.mrb[29].mxu0  ;;  %v1628_v55 = vsel %vm869_vm3, %v1619_v53, -inf }
 0x92f   : > { %1629 = vmax.xlane.f32.xlu1 %v1628_v55  ;;  %v1622_v56 = vpop.f32.mrb[30].mxu0 }
 0x930   : > { %v2589_v57 = vpop.f32.mrb[31].mxu0 }
 0x940   : > { %1649 = vrot.lane.b32.xlu1 %v3408_v13, %s3027_s16 }
 0x944   : > { %2733 = vrot.lane.b32.xlu1 %v2732_v51, %s3028_s6 }
 0x948   : > { %2738 = vrot.lane.b32.xlu1 %v2737_v41, %s3029_s11 }
 0x9b8   : > { %v1627_v58 = vpop.xlane.xlu0 %1626 }
 0x9b9   : > { %v1631_v60 = vsub.f32 %v1569_v45, %v1627_v58 }
 0x9bb   : > { %v1633_v61 = vmul.f32 1.442695, %v1631_v60 }
 0x9bc   : > { %v1630_v62 = vpop.xlane.xlu1 %1629 }
 0x9bd   : > { %2781 = vpow2.f32 %v1633_v61  ;;  %v1632_v0 = vsub.f32 %v1619_v53, %v1630_v62 }
 0x9bf   : > { %v1635_v1 = vmul.f32 1.442695, %v1632_v0 }
 0x9c0   : > { %v1650_v2 = vpop.permute.xlu1 %1649 }
 0x9c1   : > { %2783 = vpow2.f32 %v1635_v1  ;;  %v1655_v4 = vsel %vm993_vm4, %v1650_v2, 0 }
 0x9c2   : > { %2591 = vmatpush3.bf16.msra.mxu1 %v1655_v4 }
 0x9c3   : > { %2602 = vmatprep.subr.bf16.mxu1 %v3015_v3 }
 0x9c4   : > { %v2734_v29 = vpop.permute.xlu1 %2733 }
 0x9c5   : > { %v2736_v31 = vunpack.i.h.bf16 %v2734_v29  ;;  %v2735_v32 = vunpack.i.l.bf16 %v2734_v29 }
 0x9c7   : > { %v2782_v13 = vpop.eup %2781  ;;  %v1770_v36 = vsel %vm869_vm3, %v3458_v63, %v2736_v31  ;;  %v1769_v37 = vsel %vm869_vm3, %v3456_v59, %v2735_v32  ;;  %v2420_v63 = vld [vmem:[%s3744_s1] ss:$0 sm:$0xff] }
 0x9c8   : > { %v1637_v46 = vsel %vm869_vm3, %v2782_v13, 0.0  ;;  %v2739_v30 = vpop.permute.xlu1 %2738 }
 0x9c9   : > { %1638 = vadd.xlane.f32.xlu0 %v1637_v46  ;;  %v2741_v33 = vunpack.i.h.bf16 %v2739_v30  ;;  %v2740_v34 = vunpack.i.l.bf16 %v2739_v30 }
 0x9cb   : > { %v2784_v50 = vpop.eup %2783  ;;  %v1772_v40 = vsel %vm1771_vm5, %v1769_v37, %v2740_v34  ;;  %v1773_v41 = vsel %vm1771_vm5, %v1770_v36, %v2741_v33 }
 0x9cc   : > { %v1640_v51 = vsel %vm869_vm3, %v2784_v50, 0.0 }
 0x9cd   : > { %1641 = vadd.xlane.f32.xlu0 %v1640_v51 }
 0x9e3   : > { %1697 = vrot.lane.b32.xlu0 %v3411_v16, %s3027_s16 }
 0xa56   : > { %v1639_v7 = vpop.xlane.xlu0 %1638 }
 0xa57   : > { %2785 = vrcp.f32 %v1639_v7 }
 0xa5a   : > { %v1642_v8 = vpop.xlane.xlu0 %1641 }
 0xa5b   : > { %2787 = vrcp.f32 %v1642_v8 }
 0xa5e   : > { %v1698_v9 = vpop.permute.xlu0 %1697 }
 0xa5f   : > { %v1703_v10 = vsel %vm993_vm4, %v1698_v9, 0 }
 0xa60   : > { %2597 = vmatpush3.bf16.msra.mxu0 %v1703_v10 }
 0xa61   : > { %v2786_v11 = vpop.eup %2785  ;;  %2610 = vmatprep.subr.bf16.mxu0 %v3015_v3 }
 0xa62   : > { %v1645_v12 = vmul.f32 %v2786_v11, %v2782_v13  ;;  %v2752_v13 = vld [vmem:[%s3365_s0 + $0x8] sm:$0xff]   ;;  %v2425_v11 = vld [vmem:[%s756_s12] ss:$0 sm:$0xff]  ;;  %s3748_s12 = scalar_lea.vmem [#allocation5], %s3319_s5 }
 0xa64   : > { %v1647_v14 = vpack.c.bf16 %v1645_v12, %v1645_v12 }
 0xa65   : > { %v2788_v15 = vpop.eup %2787 }
 0xa66   : > { %v1646_v17 = vmul.f32 %v2788_v15, %v2784_v50  ;;  %2593 = vmatmul.mubr.msk.bf16.vlgmr.msra.gmra.mrb[28].mxu1 %vm869_vm3, %v1647_v14 }
 0xa67   : > { %2606 = vmatprep.mubr.msk.bf16.mxu1 %vm3016_vm1, %v3015_v3  ;;  %2603 = vmatpush3.bf16.msra.mxu1 %v2749_v18 }
 0xa68   : > { %v1648_v16 = vpack.c.bf16 %v1646_v17, %v1646_v17  ;;  %2604 = vmatprep.subr.bf16.mxu1 %v3015_v3 }
 0xa6a   : > { %2599 = vmatmul.mubr.msk.bf16.vlgmr.msra.gmra.mrb[32].mxu0 %vm869_vm3, %v1648_v16  ;;  %v2426_v16 = vld [vmem:[%s3747_s7] ss:$0 sm:$0xff] }
 0xa6b   : > { %2614 = vmatprep.mubr.msk.bf16.mxu0 %vm3016_vm1, %v3015_v3  ;;  %2605 = vmatpush3.bf16.msra.mxu1 %v2750_v19 }
 0xa6c   : > { %2618 = vmatprep.subr.bf16.mxu1 %v3015_v3 }
 0xb39   : > { %v1691_v20 = vpop.f32.mrb[28].mxu1 }
 0xb3a   : > { %v2594_v21 = vpop.f32.mrb[29].mxu1 }
 0xb3b   : > { %v1694_v22 = vpop.f32.mrb[30].mxu1 }
 0xb3c   : > { %v2595_v23 = vpop.f32.mrb[31].mxu1  ;;  %v2427_v22 = vld [vmem:[%s3748_s12] ss:$0 sm:$0xff] }
 0xb3d   : > { %v1739_v24 = vpop.f32.mrb[32].mxu0 }
 0xb3e   : > { %v2742_v25 = vpack.i.bf16 %v1739_v24, %v1691_v20  ;;  %v2600_v26 = vpop.f32.mrb[33].mxu0 }
 0xb3f   : > { %v1742_v27 = vpop.f32.mrb[34].mxu0 }
 0xb40   : > { %2743 = vrot.lane.b32.xlu0 %v2742_v25, %s3030_s18  ;;  %v2601_v28 = vpop.f32.mrb[35].mxu0  ;;  %s3031_s18 = smov [#allocation10]  }
 0xb41   : > { %s2157_s28 = sshll.u32 %s3031_s18, 4  ;;  %s2158_s28 = int_to_ptr.vmem [resolvable:$true] %s2157_s28 }
 0xb42   : > { %p2926_p13 = scmp.lt.s32.totalorder %s2158_s28, %s2158_s28 }
 0xbb2   : > { %v2744_v35 = vpop.permute.xlu0 %2743 }
 0xbb3   : > { %v2746_v38 = vunpack.i.h.bf16 %v2744_v35  ;;  %v2745_v39 = vunpack.i.l.bf16 %v2744_v35 }
 0xbb5   : > { %v1776_v42 = vsel %vm1774_vm6, %v1773_v41, %v2746_v38  ;;  %v1775_v43 = vsel %vm1774_vm6, %v1772_v40, %v2745_v39 }
 0xbb6   : > { %v2451_v44 = vpack.c.bf16 %v1776_v42, %v1775_v43  ;;  %v2753_v43 = vld [vmem:[%s3375_s10] sm:$0xff]  }
 0xbb8   : > { %2607 = vmatmul.mubr.msk.bf16.vlgmr.msra.gmra.mrb[32].mxu1 %vm816_vm2, %v2451_v44  ;;  %v2754_v44 = vld [vmem:[%s3375_s10 + $0x8] sm:$0xff]  }
 0xbb9   : > { %2626 = vmatprep.mubr.msk.bf16.mxu1 %vm3016_vm1, %v3015_v3  ;;  %2619 = vmatpush3.bf16.msra.mxu1 %v2753_v43 }
 0xbba   : > { %2620 = vmatprep.subr.bf16.mxu1 %v3015_v3 }
 0xbbd   : > { %2621 = vmatpush3.bf16.msra.mxu1 %v2754_v44 }
 0xbbe   : > { %2622 = vmatprep.subr.bf16.mxu1 %v3015_v3 }
 0xc8b   : > { %v1844_v45 = vpop.f32.mrb[32].mxu1 }
 0xc8c   : > { %v1845_v47 = vadd.f32 %v2420_v63, %v1844_v45  ;;  %v2608_v59 = vpop.f32.mrb[33].mxu1  ;;  %v2756_v45 = vld [vmem:[%s3375_s10 + $0x18] sm:$0xff]  }
 0xc8d   : > { %v1847_v48 = vpop.f32.mrb[34].mxu1 }
 0xc8e   : > { %v1848_v49 = vadd.f32 %v2420_v63, %v1847_v48  ;;  %v2609_v52 = vpop.f32.mrb[35].mxu1  ;;  %v1851_v53 = vadd.f32 %v1845_v47, %v3390_v5  ;;  %v2755_v63 = vld [vmem:[%s3375_s10 + $0x10] sm:$0xff]   ;;  %s3750_s10 = scalar_lea.vmem [#allocation8], %s3319_s5 }
 0xc8f   : > { %2623 = vmatpush3.bf16.msra.mxu1 %v2755_v63 }
 0xc90   : > { %v1855_v54 = vsel %vm816_vm2, %v1851_v53, 0.0  ;;  %v1852_v55 = vadd.f32 %v1848_v49, %v3392_v6  ;;  %v2751_v6 = vld [vmem:[%s3365_s0] sm:$0xff]   ;;  %2624 = vmatprep.subr.bf16.mxu1 %v3015_v3 }
 0xc91   : > { %1856 = vadd.xlane.f32.xlu1 %v1855_v54  ;;  %2611 = vmatpush3.bf16.msra.mxu0 %v2751_v6 }
 0xc92   : > { %v1858_v56 = vsel %vm816_vm2, %v1852_v55, 0.0  ;;  %2612 = vmatprep.subr.bf16.mxu0 %v3015_v3  ;;  %v2432_v3 = vld [vmem:[%s3750_s10] ss:$0 sm:$0xff] }
 0xc93   : > { %1859 = vadd.xlane.f32.xlu0 %v1858_v56  ;;  %2625 = vmatpush3.bf16.msra.mxu1 %v2756_v45 }
 0xc95   : > { %2613 = vmatpush3.bf16.msra.mxu0 %v2752_v13 }
 0xd1e   : > { %v1857_v57 = vpop.xlane.xlu1 %1856 }
 0xd1f   : > { %v1862_v58 = vmul.f32 0.03125, %v1857_v57 }
 0xd20   : > { %v1860_v60 = vpop.xlane.xlu0 %1859 }
 0xd21   : > { %v1864_v61 = vsub.f32 %v1851_v53, %v1862_v58  ;;  %v1863_v62 = vmul.f32 0.03125, %v1860_v60 }
 0xd23   : > { %v1865_v0 = vsub.f32 %v1852_v55, %v1863_v62  ;;  %v1866_v1 = vmul.f32 %v1864_v61, %v1864_v61  ;;  %v2431_v55 = vld [vmem:[%s3749_s13] ss:$0 sm:$0xff] }
 0xd25   : > { %v1868_v2 = vsel %vm816_vm2, %v1866_v1, 0.0  ;;  %v1867_v5 = vmul.f32 %v1865_v0, %v1865_v0 }
 0xd26   : > { %1869 = vadd.xlane.f32.xlu0 %v1868_v2  ;;  %v2433_v2 = vld [vmem:[%s772_s9] ss:$0 sm:$0xff] }
 0xd27   : > { %v1871_v4 = vsel %vm816_vm2, %v1867_v5, 0.0 }
 0xd28   : > { %1872 = vadd.xlane.f32.xlu1 %v1871_v4 }
 0xdb3   : > { %v1870_v46 = vpop.xlane.xlu0 %1869 }
 0xdb4   : > { %v1874_v50 = vmul.f32 0.03125, %v1870_v46 }
 0xdb5   : > { %v1873_v51 = vpop.xlane.xlu1 %1872 }
 0xdb6   : > { %v1876_v7 = vadd.f32 1e-05, %v1874_v50  ;;  %v1875_v8 = vmul.f32 0.03125, %v1873_v51 }
 0xdb8   : > { %2789 = vrsqrt.f32 %v1876_v7  ;;  %v1877_v9 = vadd.f32 1e-05, %v1875_v8 }
 0xdba   : > { %2791 = vrsqrt.f32 %v1877_v9 }
 0xdc2   : > { %v2790_v10 = vpop.eup %2789 }
 0xdc3   : > { %v1880_v12 = vmul.f32 %v2790_v10, %v1864_v61 }
 0xdc4   : > { %v2792_v14 = vpop.eup %2791 }
 0xdc5   : > { %v1888_v15 = vmul.f32 %v2425_v11, %v1880_v12  ;;  %v1881_v17 = vmul.f32 %v2792_v14, %v1865_v0 }
 0xdc7   : > { %v1889_v18 = vmul.f32 %v2425_v11, %v1881_v17  ;;  %v3581_v19 = vadd.f32 %v2426_v16, %v1888_v15 }
 0xdc9   : > { %v3583_v20 = vadd.f32 %v2426_v16, %v1889_v18 }
 0xdcb   : > { %v1898_v21 = vpack.c.bf16 %v3583_v20, %v3581_v19 }
 0xdcd   : > { %2615 = vmatmul.mubr.msk.bf16.vlgmr.msra.gmra.mrb[36].mxu0 %vm816_vm2, %v1898_v21 }
 0xea0   : > { %v1959_v23 = vpop.f32.mrb[36].mxu0 }
 0xea1   : > { %v1960_v24 = vadd.f32 %v2427_v22, %v1959_v23  ;;  %v2616_v25 = vpop.f32.mrb[37].mxu0 }
 0xea2   : > { %v1962_v26 = vpop.f32.mrb[38].mxu0 }
 0xea3   : > { %v1966_v27 = vmax.f32 %v1960_v24, 0.0  ;;  %v1963_v28 = vadd.f32 %v2427_v22, %v1962_v26  ;;  %v2617_v29 = vpop.f32.mrb[39].mxu0 }
 0xea5   : > { %v1967_v30 = vmax.f32 %v1963_v28, 0.0  ;;  %v1971_v31 = vsel %vm1970_vm7, %v1966_v27, 0.0 }
 0xea6   : > { %1972 = vadd.xlane.f32.xlu0 %v1971_v31 }
 0xea7   : > { %v1974_v32 = vsel %vm1970_vm7, %v1967_v30, 0.0 }
 0xea8   : > { %1975 = vadd.xlane.f32.xlu1 %v1974_v32 }
 0xf33   : > { %v1973_v33 = vpop.xlane.xlu0 %1972 }
 0xf34   : > { %v1978_v34 = vmul.f32 0.015625, %v1973_v33  ;;  %v2440_v33 = vld [vmem:[%s778_s22] ss:$0 sm:$0xff] }
 0xf35   : > { %v1976_v35 = vpop.xlane.xlu1 %1975 }
 0xf36   : > { %v1980_v36 = vsub.f32 %v1966_v27, %v1978_v34  ;;  %v1979_v37 = vmul.f32 0.015625, %v1976_v35 }
 0xf38   : > { %v1981_v38 = vsub.f32 %v1967_v30, %v1979_v37  ;;  %v1982_v39 = vmul.f32 %v1980_v36, %v1980_v36  ;;  %v2439_v30 = vld [vmem:[%s775_s30] ss:$0 sm:$0xff]  ;;  %s2919_s30 = scalar_lea.vmem %s2158_s28, 256 }
 0xf39   : > { %p2920_p7 = scmp.ne.s32.totalorder %s2158_s28, %s2919_s30  ;;  %p2927_p3 = scmp.lt.s32.totalorder %s2919_s30, %s2919_s30 }
 0xf3a   : > { %v1984_v40 = vsel %vm1970_vm7, %v1982_v39, 0.0  ;;  %v1983_v41 = vmul.f32 %v1981_v38, %v1981_v38 }
 0xf3b   : > { %1985 = vadd.xlane.f32.xlu0 %v1984_v40  ;;  %p2921_p2 = pnand %p2920_p7, %p2661_p4  ;;  %p2928_p10 = por %p2927_p3, %p2926_p13 }
 0xf3c   : > { %v1987_v42 = vsel %vm1970_vm7, %v1983_v41, 0.0 }
 0xf3d   : > { %1988 = vadd.xlane.f32.xlu1 %v1987_v42  ;;  %p2922_p8 = pneg %p2921_p2 }
 0xf3f   : > { %p2929_p12 = pnand %p2928_p10, %p2922_p8 }
 0xfc8   : > { %v1986_v47 = vpop.xlane.xlu0 %1985 }
 0xfc9   : > { %v1990_v59 = vmul.f32 0.015625, %v1986_v47 }
 0xfca   : > { %v1989_v48 = vpop.xlane.xlu1 %1988 }
 0xfcb   : > { %v1992_v49 = vadd.f32 1e-05, %v1990_v59  ;;  %v1991_v52 = vmul.f32 0.015625, %v1989_v48 }
 0xfcd   : > { %2793 = vrsqrt.f32 %v1992_v49  ;;  %v1993_v53 = vadd.f32 1e-05, %v1991_v52 }
 0xfcf   : > { %2795 = vrsqrt.f32 %v1993_v53 }
 0xfd7   : > { %v2794_v54 = vpop.eup %2793 }
 0xfd8   : > { %v1996_v56 = vmul.f32 %v2794_v54, %v1980_v36 }
 0xfd9   : > { %v2796_v57 = vpop.eup %2795 }
 0xfda   : > { %v2004_v58 = vmul.f32 %v2431_v55, %v1996_v56  ;;  %v1997_v60 = vmul.f32 %v2796_v57, %v1981_v38 }
 0xfdc   : > { %v2005_v61 = vmul.f32 %v2431_v55, %v1997_v60  ;;  %v2012_v62 = vadd.f32 %v2432_v3, %v2004_v58 }
 0xfde   : > { %v2013_v0 = vadd.f32 %v2432_v3, %v2005_v61 }
 0xfe0   : > { %v2014_v1 = vpack.c.bf16 %v2013_v0, %v2012_v62 }
 0xfe2   : > { %2627 = vmatmul.mubr.msk.bf16.vlgmr.msra.gmra.mrb[36].mxu1 %vm1970_vm7, %v2014_v1 }
0x10b5   : > { %v2091_v5 = vpop.f32.mrb[36].mxu1 }
0x10b6   : > { %v2092_v4 = vadd.f32 %v2433_v2, %v2091_v5  ;;  %v2628_v6 = vpop.f32.mrb[37].mxu1 }
0x10b7   : > { %v2094_v13 = vpop.f32.mrb[38].mxu1 }
0x10b8   : > { %v2098_v46 = vmax.f32 %v2092_v4, 0.0  ;;  %v2095_v50 = vadd.f32 %v2433_v2, %v2094_v13  ;;  %v2629_v51 = vpop.f32.mrb[39].mxu1 }
0x10ba   : > { %v2099_v7 = vmax.f32 %v2095_v50, 0.0  ;;  %v2100_v8 = vadd.f32 %v2098_v46, %v3581_v19 }
0x10bc   : > { %v2104_v9 = vsel %vm816_vm2, %v2100_v8, 0.0  ;;  %v2101_v10 = vadd.f32 %v2099_v7, %v3583_v20 }
0x10bd   : > { %2105 = vadd.xlane.f32.xlu0 %v2104_v9 }
0x10be   : > { %v2107_v11 = vsel %vm816_vm2, %v2101_v10, 0.0 }
0x10bf   : > { %2108 = vadd.xlane.f32.xlu1 %v2107_v11 }
0x114a   : > { %v2106_v12 = vpop.xlane.xlu0 %2105 }
0x114b   : > { %v2110_v14 = vmul.f32 0.03125, %v2106_v12 }
0x114c   : > { %v2109_v15 = vpop.xlane.xlu1 %2108 }
0x114d   : > { %v2112_v17 = vsub.f32 %v2100_v8, %v2110_v14  ;;  %v2111_v16 = vmul.f32 0.03125, %v2109_v15 }
0x114f   : > { %v2113_v18 = vsub.f32 %v2101_v10, %v2111_v16  ;;  %v2114_v21 = vmul.f32 %v2112_v17, %v2112_v17 }
0x1151   : > { %v2116_v22 = vsel %vm816_vm2, %v2114_v21, 0.0  ;;  %v2115_v23 = vmul.f32 %v2113_v18, %v2113_v18 }
0x1152   : > { %2117 = vadd.xlane.f32.xlu0 %v2116_v22 }
0x1153   : > { %v2119_v19 = vsel %vm816_vm2, %v2115_v23, 0.0 }
0x1154   : > { %2120 = vadd.xlane.f32.xlu1 %v2119_v19 }
0x11df   : > { %v2118_v20 = vpop.xlane.xlu0 %2117 }
0x11e0   : > { %v2122_v24 = vmul.f32 0.03125, %v2118_v20 }
0x11e1   : > { %v2121_v25 = vpop.xlane.xlu1 %2120 }
0x11e2   : > { %v2124_v26 = vadd.f32 1e-05, %v2122_v24  ;;  %v2123_v27 = vmul.f32 0.03125, %v2121_v25 }
0x11e4   : > { %2797 = vrsqrt.f32 %v2124_v26  ;;  %v2125_v28 = vadd.f32 1e-05, %v2123_v27 }
0x11e6   : > { %2799 = vrsqrt.f32 %v2125_v28 }
0x11ee   : > { %v2798_v29 = vpop.eup %2797 }
0x11ef   : > { %v2128_v31 = vmul.f32 %v2798_v29, %v2112_v17 }
0x11f0   : > { %v2800_v32 = vpop.eup %2799 }
0x11f1   : > { %v2136_v34 = vmul.f32 %v2439_v30, %v2128_v31  ;;  %v2129_v35 = vmul.f32 %v2800_v32, %v2113_v18 }
0x11f3   : > { %v2137_v36 = vmul.f32 %v2439_v30, %v2129_v35  ;;  %v2144_v37 = vadd.f32 %v2440_v33, %v2136_v34 }
0x11f5   : > { %v2145_v38 = vadd.f32 %v2440_v33, %v2137_v36  ;;  %2146 = vst.msk [vmem:[#allocation10] sm:$0xff] %vm816_vm2, %v2144_v37 }
0x11f7   : > { %2147 = vst.msk [vmem:[#allocation10 + $0x8] sm:$0xff] %vm816_vm2, %v2145_v38 }
0x11f8   : > { %2932 = shalt.err (!%p2929_p12)
}
0x11f9   : > { %s3754_s27 = sld [smem:[#allocation33_spill]] }
0x11ff   : > { %s2933_s1 = scalar_lea.hbm %s3754_s27, 256 }
0x1200   : > { %p2934_p11 = scmp.ne.s32.totalorder %s3754_s27, %s2933_s1  ;;  %p2939_p6 = scmp.lt.u32.totalorder %s2933_s1, %s3754_s27 }
0x1202   : > { %p2935_p5 = pnand %p2934_p11, %p2661_p4 }
0x1204   : > { %p2936_p9 = pneg %p2935_p5 }
0x1206   : > { %p2941_p0 = pnand %p2939_p6, %p2936_p9 }
0x1208   : > { %2944 = shalt.err (!%p2941_p0)
}
0x1209   : > { %s3032_s14 = smov 128  }
0x120a   : > { %2641 = dma.vmem_to_hbm [thread:$0]  (%p2661_p4), %s2158_s28, 256, %s3754_s27, [#allocation4], %s3032_s14, %s3032_s14, %s3028_s6  }
0x120b   : > { %2982 = dma.done.wait (%p2661_p4), [#allocation4], 256  }
0x120c   : > { %2984 = vsyncadd (%p2661_p4), [#allocation4], 4294967040 }
0x120d PF: > { %s3755_s12 = sld [smem:[#allocation17_spill]]  ;;  %s3756_s13 = sld [smem:[#allocation15_spill]] }
0x120e   : > { %s3757_s20 = sld [smem:[#allocation19_spill]]  ;;  %s3758_s21 = sld [smem:[#allocation16_spill]] }
0x120f   : > { %s3759_s22 = sld [smem:[#allocation18_spill]]  ;;  %s3760_s18 = smov %s2991_s19 }
0x1213   : > { %s33_s23 = sadd.s32 1, %s3755_s12   ;;  %s3761_s19 = smov %s3756_s13 }
0x1214   : > { %p30_p1 = scmp.ge.s32.totalorder %s33_s23, 4  }
0x1216   :  { %32 = sbr.rel (!%p30_p1) target bundleno = 23 (0x17), region = 185 }
0x121d   :  { %2173 = vsyncpa [#allocation3], 1 }
0x121e   :  { %2175 = vsyncpa [#allocation3 + $0x1], 1 }
0x121f   :  { %2176 = vsyncpa [#allocation6], 1 }
0x1220   :  { %2178 = vsyncpa [#allocation6 + $0x1], 1 }
0x1221   :  { %2179 = vsyncpa [#allocation9], 1 }
0x1222   :  { %2181 = vsyncpa [#allocation9 + $0x1], 1 }
0x1223   :  { %2182 = vsyncpa [#allocation4], 1 }
0x1224   :  { %2184 = vsyncpa [#allocation4 + $0x1], 1 }

</bundles_post_ra>
